<compile_context>
chip_gen: v7x
topology: tpu7x:2x2x1
jax: 0.10.0
libtpu: 0.0.40
codegen_flags: <defaults>
</compile_context>

<pallas_src>
import functools

import jax
import jax.numpy as jnp
from jax.experimental import pallas as pl
from jax.experimental.pallas import tpu as pltpu


# ------------------------------ fused kernel --------------------------------

def _lenet5_kernel(x1_ref, w1e_ref, b1e_ref, w2e_ref, b2e_ref,
                   w1g_ref, b1c_ref, w2f_ref, b2c_ref, w3f_ref, b3c_ref,
                   o_ref):
    """Whole LeNet-5 forward on VMEM-resident data.

    x1_ref : (64, 49*N)  mod-4 "tap planes" of the padded input.
             Row EY*8+EX holds xpad[n, 4*i+EY, 4*j+EX] flattened over (i,j,n).
    w1e_ref: (128, 64)   conv1 weights scattered per (pool-corner, parity-block).
    b1e_ref: (32, 1)     conv1 bias, channels padded 6->8, repeated per block.
    w2e_ref: (64, 288)   conv2 weights scattered per pool-corner, columns
                         ordered (ey, ex, c_pad8).
    b2e_ref: (16, 1)     conv2 bias.
    w1g_ref: (120, 400)  fc1 weight, columns permuted to (pixel, channel) order.
    w2f/w3f : (84,120)/(10,84) fc2/fc3 weights (PyTorch row-major, used as W@x).
    o_ref  : (10, N)     log-probabilities, transposed (classes on sublanes).
    """
    n = o_ref.shape[1]

    # ---- conv1 + ReLU + 2x2 maxpool : ONE MXU matmul + corner max ----------
    z1 = jnp.dot(w1e_ref[...], x1_ref[...],
                 preferred_element_type=jnp.float32)          # (128, 49n)
    z1c = jnp.maximum(jnp.maximum(z1[0:32], z1[32:64]),
                      jnp.maximum(z1[64:96], z1[96:128]))     # max over corners
    # rows = parity_block*8 + channel, lanes = (i, j, n) of the pooled 14x14
    # map split into 4 parity blocks of 7x7.
    a1 = jnp.maximum(z1c + b1e_ref[...], 0.0)                 # (32, 49n)

    # ---- conv2 + ReLU + 2x2 maxpool : in-kernel im2col from VMEM a1 --------
    # Patch rows grouped by (ey, ex) = (a+ky, b+kx); each group is a pure
    # lane/sublane slice of a1 (no patch tensor ever hits HBM).
    p_blocks = []
    for p in range(5):                       # conv2 pooled output row
        rows = []
        for ey in range(6):
            for ex in range(6):
                blk = (ey % 2) * 2 + (ex % 2)
                start = (p + ey // 2) * 7 * n + (ex // 2) * n
                rows.append(a1[blk * 8:blk * 8 + 8, start:start + 5 * n])
        p_blocks.append(jnp.concatenate(rows, axis=0))        # (288, 5n)
    r2 = jnp.concatenate(p_blocks, axis=1)                    # (288, 25n)

    z2 = jnp.dot(w2e_ref[...], r2,
                 preferred_element_type=jnp.float32)          # (64, 25n)
    z2c = jnp.maximum(jnp.maximum(z2[0:16], z2[16:32]),
                      jnp.maximum(z2[32:48], z2[48:64]))      # max over corners
    a2 = jnp.maximum(z2c + b2e_ref[...], 0.0)                 # (16, 25n), lanes=(P,Q,n)

    # ---- NCHW flatten for fc1, in-kernel (no HBM round trip) ---------------
    g = jnp.concatenate([a2[:, pq * n:(pq + 1) * n] for pq in range(25)],
                        axis=0)                               # (400, n)

    # ---- fc1 -> fc2 -> fc3 -> log_softmax (transposed, batch on lanes) -----
    # Reference applies no activation between the FC layers.
    h1 = jnp.dot(w1g_ref[...], g,
                 preferred_element_type=jnp.float32) + b1c_ref[...]   # (120, n)
    h2 = jnp.dot(w2f_ref[...], h1,
                 preferred_element_type=jnp.float32) + b2c_ref[...]   # (84, n)
    y = jnp.dot(w3f_ref[...], h2,
                preferred_element_type=jnp.float32) + b3c_ref[...]    # (10, n)

    m = jnp.max(y, axis=0, keepdims=True)
    z = y - m
    lse = jnp.log(jnp.sum(jnp.exp(z), axis=0, keepdims=True))
    o_ref[...] = (z - lse).astype(o_ref.dtype)


def _lenet5_pallas(x1, kp, n):
    flops = 2 * n * (128 * 64 * 49 + 64 * 288 * 25
                     + 120 * 400 + 84 * 120 + 10 * 84)
    weight_bytes = 4 * (128 * 64 + 32 + 64 * 288 + 16
                        + 120 * 400 + 120 + 84 * 120 + 84 + 10 * 84 + 10)
    bytes_accessed = 4 * (64 * 49 * n + 10 * n) + weight_bytes
    vmem = pl.BlockSpec(memory_space=pltpu.MemorySpace.VMEM)
    return pl.pallas_call(
        _lenet5_kernel,
        out_shape=jax.ShapeDtypeStruct((10, n), jnp.float32),
        in_specs=[vmem] * 11,
        out_specs=vmem,
        compiler_params=pltpu.CompilerParams(
            vmem_limit_bytes=32 * 1024 * 1024),
        cost_estimate=pl.CostEstimate(flops=flops,
                                      transcendentals=11 * n,
                                      bytes_accessed=bytes_accessed),
    )(x1, kp["w1e"], kp["b1e"], kp["w2e"], kp["b2e"],
      kp["w1g"], kp["b1c"], kp["w2f"], kp["b2c"], kp["w3f"], kp["b3c"])


# ------------------------------ parameters ----------------------------------

def init_params(key):
    """PyTorch-layout LeNet-5 parameters (uniform +-1/sqrt(fan_in))."""
    ks = jax.random.split(key, 10)

    def u(k, shape, fan_in):
        bound = 1.0 / float(fan_in) ** 0.5
        return jax.random.uniform(k, shape, jnp.float32, -bound, bound)

    return {
        "c1_w": u(ks[0], (6, 1, 5, 5), 25),   "c1_b": u(ks[1], (6,), 25),
        "c3_w": u(ks[2], (16, 6, 5, 5), 150), "c3_b": u(ks[3], (16,), 150),
        "fc1_w": u(ks[4], (120, 400), 400),   "fc1_b": u(ks[5], (120,), 400),
        "fc2_w": u(ks[6], (84, 120), 120),    "fc2_b": u(ks[7], (84,), 120),
        "fc3_w": u(ks[8], (10, 84), 84),      "fc3_b": u(ks[9], (10,), 84),
    }


def prepare_params(p):
    """One-time repack of PyTorch-layout params into kernel-ready layout."""
    f32 = jnp.float32
    c1w = p["c1_w"].reshape(6, 5, 5).astype(f32)          # (c, ky, kx)
    c3w_t = p["c3_w"].astype(f32).transpose(0, 2, 3, 1)   # (oc, ky, kx, c)

    # conv1: corner-scattered weight matrix (128, 64).
    # Row = (corner a*2+b)*32 + (parity block ry*2+rx)*8 + channel(pad to 8).
    # Col = EY*8 + EX where EY = 2*ry + a + ky, EX = 2*rx + b + kx.
    w1_blocks = []
    for a in range(2):
        for b in range(2):
            for ry in range(2):
                for rx in range(2):
                    blk = jnp.zeros((8, 8, 8), f32)        # (c, EY, EX)
                    blk = blk.at[:6,
                                 2 * ry + a:2 * ry + a + 5,
                                 2 * rx + b:2 * rx + b + 5].set(c1w)
                    w1_blocks.append(blk.reshape(8, 64))
    w1e = jnp.concatenate(w1_blocks, axis=0)               # (128, 64)
    b1e = jnp.tile(jnp.pad(p["c1_b"].astype(f32), (0, 2)), 4).reshape(32, 1)

    # conv2: corner-scattered weight matrix (64, 288).
    # Row = corner*16 + oc.  Col = (ey*6 + ex)*8 + c  (c padded 6->8).
    w2_blocks = []
    for a in range(2):
        for b in range(2):
            blk = jnp.zeros((16, 6, 6, 8), f32)            # (oc, ey, ex, c)
            blk = blk.at[:, a:a + 5, b:b + 5, :6].set(c3w_t)
            w2_blocks.append(blk.reshape(16, 288))
    w2e = jnp.concatenate(w2_blocks, axis=0)               # (64, 288)
    b2e = p["c3_b"].astype(f32).reshape(16, 1)

    # fc1: permute columns from (channel, pixel) to (pixel, channel) order so
    # the in-kernel flatten is a plain concat of lane slices.
    w1g = (p["fc1_w"].astype(f32).reshape(120, 16, 25)
           .transpose(0, 2, 1).reshape(120, 400))

    return {
        "w1e": w1e, "b1e": b1e, "w2e": w2e, "b2e": b2e,
        "w1g": w1g, "b1c": p["fc1_b"].astype(f32).reshape(120, 1),
        "w2f": p["fc2_w"].astype(f32),
        "b2c": p["fc2_b"].astype(f32).reshape(84, 1),
        "w3f": p["fc3_w"].astype(f32),
        "b3c": p["fc3_b"].astype(f32).reshape(10, 1),
    }


# ------------------------------ forward pass ---------------------------------

@jax.jit
def lenet5_forward(kparams, x):
    """kparams must come from prepare_params(); x is NCHW (N, 1, 28, 28)."""
    n = x.shape[0]
    # Tiny host-side prep (~3x input bytes, fuses in XLA): mod-4 "tap planes"
    # of the padded image.  Plane EY*8+EX holds xpad[n, 4*i+EY, 4*j+EX].
    xpad = jnp.pad(x[:, 0], ((0, 0), (2, 2), (2, 2)))              # (N, 32, 32)
    planes = [xpad[:, ey:ey + 28:4, ex:ex + 28:4]                  # (N, 7, 7)
              for ey in range(8) for ex in range(8)]
    x1 = (jnp.stack(planes, axis=0)                                # (64, N, 7, 7)
          .transpose(0, 2, 3, 1)                                   # (64, 7, 7, N)
          .reshape(64, 49 * n))

    out_t = _lenet5_pallas(x1, kparams, n)                         # (10, N)
    return out_t.T                                                 # (N, 10)


# ------------------------------ pure-JAX reference ---------------------------

def lenet5_reference(p, x):
    dn = ("NCHW", "OIHW", "NCHW")
    z = jax.lax.conv_general_dilated(x, p["c1_w"], (1, 1), [(2, 2), (2, 2)],
                                     dimension_numbers=dn)
    z = jax.nn.relu(z + p["c1_b"].reshape(1, 6, 1, 1))
    z = jax.lax.reduce_window(z, -jnp.inf, jax.lax.max,
                              (1, 1, 2, 2), (1, 1, 2, 2), "VALID")
    z = jax.lax.conv_general_dilated(z, p["c3_w"], (1, 1), [(0, 0), (0, 0)],
                                     dimension_numbers=dn)
    z = jax.nn.relu(z + p["c3_b"].reshape(1, 16, 1, 1))
    z = jax.lax.reduce_window(z, -jnp.inf, jax.lax.max,
                              (1, 1, 2, 2), (1, 1, 2, 2), "VALID")
    f = z.reshape(z.shape[0], 16 * 5 * 5)
    h = f @ p["fc1_w"].T + p["fc1_b"]
    h = h @ p["fc2_w"].T + p["fc2_b"]
    y = h @ p["fc3_w"].T + p["fc3_b"]
    return jax.nn.log_softmax(y, axis=1)


# ----------------------------------- main ------------------------------------

if __name__ == "__main__":
    key = jax.random.PRNGKey(0)
    k_params, k_x = jax.random.split(key)
    raw_params = init_params(k_params)
    kparams = prepare_params(raw_params)

    # LeNet-5 geometry requires 28x28 single-channel inputs (fc1 expects 16*5*5).
    x = jax.random.normal(k_x, (2, 1, 28, 28), dtype=jnp.float32)

    out = jax.block_until_ready(lenet5_forward(kparams, x))
    assert out.shape == (2, 10), out.shape

    # log_softmax rows should exponentiate-sum to ~1.
    assert bool(jnp.all(jnp.abs(jnp.sum(jnp.exp(out), axis=1) - 1.0) < 1e-3))

    # Numerical parity against a pure-JAX reference of the PyTorch module.
    ref = jax.block_until_ready(lenet5_reference(raw_params, x))
    assert bool(jnp.allclose(out, ref, atol=2e-2, rtol=2e-2)), (
        float(jnp.max(jnp.abs(out - ref))))

    print("KERNEL_OK")
</pallas_src>

<mosaic_0001>
module attributes {stable_mosaic.version = 11 : i64} {
  func.func @_lenet5_kernel(%arg0: memref<64x98xf32, #tpu.memory_space<vmem>>, %arg1: memref<128x64xf32, #tpu.memory_space<vmem>>, %arg2: memref<32x1xf32, #tpu.memory_space<vmem>>, %arg3: memref<64x288xf32, #tpu.memory_space<vmem>>, %arg4: memref<16x1xf32, #tpu.memory_space<vmem>>, %arg5: memref<120x400xf32, #tpu.memory_space<vmem>>, %arg6: memref<120x1xf32, #tpu.memory_space<vmem>>, %arg7: memref<84x120xf32, #tpu.memory_space<vmem>>, %arg8: memref<84x1xf32, #tpu.memory_space<vmem>>, %arg9: memref<10x84xf32, #tpu.memory_space<vmem>>, %arg10: memref<10x1xf32, #tpu.memory_space<vmem>>, %arg11: memref<10x2xf32, #tpu.memory_space<vmem>>) attributes {dimension_semantics = [], scalar_prefetch = 0 : i64, scratch_operands = 0 : i64, tpu.core_type = #tpu.core_type<tc>} {
    %c0 = arith.constant 0 : index
    %c0_0 = arith.constant 0 : index
    %0 = vector.load %arg1[%c0, %c0_0] : memref<128x64xf32, #tpu.memory_space<vmem>>, vector<128x64xf32>
    %c0_1 = arith.constant 0 : index
    %c0_2 = arith.constant 0 : index
    %1 = vector.load %arg0[%c0_1, %c0_2] : memref<64x98xf32, #tpu.memory_space<vmem>>, vector<64x98xf32>
    %cst = arith.constant dense<0.000000e+00> : vector<128x98xf32>
    %2 = tpu.matmul %0, %1, %cst {dimension_numbers = #tpu.dot_dimension_numbers<[1], [0], [0], [1], [0, 0, 1, 1], [], []>} : vector<128x64xf32>, vector<64x98xf32>, vector<128x98xf32> -> vector<128x98xf32>
    %3 = vector.extract_strided_slice %2 {offsets = [0, 0], sizes = [32, 98], strides = [1, 1]} : vector<128x98xf32> to vector<32x98xf32>
    %4 = vector.extract_strided_slice %2 {offsets = [32, 0], sizes = [32, 98], strides = [1, 1]} : vector<128x98xf32> to vector<32x98xf32>
    %5 = arith.maximumf %3, %4 : vector<32x98xf32>
    %6 = vector.extract_strided_slice %2 {offsets = [64, 0], sizes = [32, 98], strides = [1, 1]} : vector<128x98xf32> to vector<32x98xf32>
    %7 = vector.extract_strided_slice %2 {offsets = [96, 0], sizes = [32, 98], strides = [1, 1]} : vector<128x98xf32> to vector<32x98xf32>
    %8 = arith.maximumf %6, %7 : vector<32x98xf32>
    %9 = arith.maximumf %5, %8 : vector<32x98xf32>
    %c0_3 = arith.constant 0 : index
    %c0_4 = arith.constant 0 : index
    %10 = vector.load %arg2[%c0_3, %c0_4] : memref<32x1xf32, #tpu.memory_space<vmem>>, vector<32x1xf32>
    %11 = vector.broadcast %10 : vector<32x1xf32> to vector<32x98xf32>
    %12 = arith.addf %9, %11 : vector<32x98xf32>
    %cst_5 = arith.constant 0.000000e+00 : f32
    %13 = vector.broadcast %cst_5 : f32 to vector<32x98xf32>
    %14 = arith.maximumf %12, %13 : vector<32x98xf32>
    %15 = vector.extract_strided_slice %14 {offsets = [0, 0], sizes = [8, 10], strides = [1, 1]} : vector<32x98xf32> to vector<8x10xf32>
    %16 = vector.extract_strided_slice %14 {offsets = [8, 0], sizes = [8, 10], strides = [1, 1]} : vector<32x98xf32> to vector<8x10xf32>
    %17 = vector.extract_strided_slice %14 {offsets = [0, 2], sizes = [8, 10], strides = [1, 1]} : vector<32x98xf32> to vector<8x10xf32>
    %18 = vector.extract_strided_slice %14 {offsets = [8, 2], sizes = [8, 10], strides = [1, 1]} : vector<32x98xf32> to vector<8x10xf32>
    %19 = vector.extract_strided_slice %14 {offsets = [0, 4], sizes = [8, 10], strides = [1, 1]} : vector<32x98xf32> to vector<8x10xf32>
    %20 = vector.extract_strided_slice %14 {offsets = [8, 4], sizes = [8, 10], strides = [1, 1]} : vector<32x98xf32> to vector<8x10xf32>
    %21 = vector.extract_strided_slice %14 {offsets = [16, 0], sizes = [8, 10], strides = [1, 1]} : vector<32x98xf32> to vector<8x10xf32>
    %22 = vector.extract_strided_slice %14 {offsets = [24, 0], sizes = [8, 10], strides = [1, 1]} : vector<32x98xf32> to vector<8x10xf32>
    %23 = vector.extract_strided_slice %14 {offsets = [16, 2], sizes = [8, 10], strides = [1, 1]} : vector<32x98xf32> to vector<8x10xf32>
    %24 = vector.extract_strided_slice %14 {offsets = [24, 2], sizes = [8, 10], strides = [1, 1]} : vector<32x98xf32> to vector<8x10xf32>
    %25 = vector.extract_strided_slice %14 {offsets = [16, 4], sizes = [8, 10], strides = [1, 1]} : vector<32x98xf32> to vector<8x10xf32>
    %26 = vector.extract_strided_slice %14 {offsets = [24, 4], sizes = [8, 10], strides = [1, 1]} : vector<32x98xf32> to vector<8x10xf32>
    %27 = vector.extract_strided_slice %14 {offsets = [0, 14], sizes = [8, 10], strides = [1, 1]} : vector<32x98xf32> to vector<8x10xf32>
    %28 = vector.extract_strided_slice %14 {offsets = [8, 14], sizes = [8, 10], strides = [1, 1]} : vector<32x98xf32> to vector<8x10xf32>
    %29 = vector.extract_strided_slice %14 {offsets = [0, 16], sizes = [8, 10], strides = [1, 1]} : vector<32x98xf32> to vector<8x10xf32>
    %30 = vector.extract_strided_slice %14 {offsets = [8, 16], sizes = [8, 10], strides = [1, 1]} : vector<32x98xf32> to vector<8x10xf32>
    %31 = vector.extract_strided_slice %14 {offsets = [0, 18], sizes = [8, 10], strides = [1, 1]} : vector<32x98xf32> to vector<8x10xf32>
    %32 = vector.extract_strided_slice %14 {offsets = [8, 18], sizes = [8, 10], strides = [1, 1]} : vector<32x98xf32> to vector<8x10xf32>
    %33 = vector.extract_strided_slice %14 {offsets = [16, 14], sizes = [8, 10], strides = [1, 1]} : vector<32x98xf32> to vector<8x10xf32>
    %34 = vector.extract_strided_slice %14 {offsets = [24, 14], sizes = [8, 10], strides = [1, 1]} : vector<32x98xf32> to vector<8x10xf32>
    %35 = vector.extract_strided_slice %14 {offsets = [16, 16], sizes = [8, 10], strides = [1, 1]} : vector<32x98xf32> to vector<8x10xf32>
    %36 = vector.extract_strided_slice %14 {offsets = [24, 16], sizes = [8, 10], strides = [1, 1]} : vector<32x98xf32> to vector<8x10xf32>
    %37 = vector.extract_strided_slice %14 {offsets = [16, 18], sizes = [8, 10], strides = [1, 1]} : vector<32x98xf32> to vector<8x10xf32>
    %38 = vector.extract_strided_slice %14 {offsets = [24, 18], sizes = [8, 10], strides = [1, 1]} : vector<32x98xf32> to vector<8x10xf32>
    %39 = vector.extract_strided_slice %14 {offsets = [0, 28], sizes = [8, 10], strides = [1, 1]} : vector<32x98xf32> to vector<8x10xf32>
    %40 = vector.extract_strided_slice %14 {offsets = [8, 28], sizes = [8, 10], strides = [1, 1]} : vector<32x98xf32> to vector<8x10xf32>
    %41 = vector.extract_strided_slice %14 {offsets = [0, 30], sizes = [8, 10], strides = [1, 1]} : vector<32x98xf32> to vector<8x10xf32>
    %42 = vector.extract_strided_slice %14 {offsets = [8, 30], sizes = [8, 10], strides = [1, 1]} : vector<32x98xf32> to vector<8x10xf32>
    %43 = vector.extract_strided_slice %14 {offsets = [0, 32], sizes = [8, 10], strides = [1, 1]} : vector<32x98xf32> to vector<8x10xf32>
    %44 = vector.extract_strided_slice %14 {offsets = [8, 32], sizes = [8, 10], strides = [1, 1]} : vector<32x98xf32> to vector<8x10xf32>
    %45 = vector.extract_strided_slice %14 {offsets = [16, 28], sizes = [8, 10], strides = [1, 1]} : vector<32x98xf32> to vector<8x10xf32>
    %46 = vector.extract_strided_slice %14 {offsets = [24, 28], sizes = [8, 10], strides = [1, 1]} : vector<32x98xf32> to vector<8x10xf32>
    %47 = vector.extract_strided_slice %14 {offsets = [16, 30], sizes = [8, 10], strides = [1, 1]} : vector<32x98xf32> to vector<8x10xf32>
    %48 = vector.extract_strided_slice %14 {offsets = [24, 30], sizes = [8, 10], strides = [1, 1]} : vector<32x98xf32> to vector<8x10xf32>
    %49 = vector.extract_strided_slice %14 {offsets = [16, 32], sizes = [8, 10], strides = [1, 1]} : vector<32x98xf32> to vector<8x10xf32>
    %50 = vector.extract_strided_slice %14 {offsets = [24, 32], sizes = [8, 10], strides = [1, 1]} : vector<32x98xf32> to vector<8x10xf32>
    %51 = tpu.concatenate %15, %16, %17, %18, %19, %20, %21, %22, %23, %24, %25, %26, %27, %28, %29, %30 in 0 : vector<8x10xf32>, vector<8x10xf32>, vector<8x10xf32>, vector<8x10xf32>, vector<8x10xf32>, vector<8x10xf32>, vector<8x10xf32>, vector<8x10xf32>, vector<8x10xf32>, vector<8x10xf32>, vector<8x10xf32>, vector<8x10xf32>, vector<8x10xf32>, vector<8x10xf32>, vector<8x10xf32>, vector<8x10xf32> -> vector<128x10xf32>
    %52 = tpu.concatenate %31, %32, %33, %34, %35, %36, %37, %38, %39, %40, %41, %42, %43, %44, %45, %46 in 0 : vector<8x10xf32>, vector<8x10xf32>, vector<8x10xf32>, vector<8x10xf32>, vector<8x10xf32>, vector<8x10xf32>, vector<8x10xf32>, vector<8x10xf32>, vector<8x10xf32>, vector<8x10xf32>, vector<8x10xf32>, vector<8x10xf32>, vector<8x10xf32>, vector<8x10xf32>, vector<8x10xf32>, vector<8x10xf32> -> vector<128x10xf32>
    %53 = tpu.concatenate %47, %48, %49, %50 in 0 : vector<8x10xf32>, vector<8x10xf32>, vector<8x10xf32>, vector<8x10xf32> -> vector<32x10xf32>
    %54 = tpu.concatenate %51, %52, %53 in 0 : vector<128x10xf32>, vector<128x10xf32>, vector<32x10xf32> -> vector<288x10xf32>
    %55 = vector.extract_strided_slice %14 {offsets = [0, 14], sizes = [8, 10], strides = [1, 1]} : vector<32x98xf32> to vector<8x10xf32>
    %56 = vector.extract_strided_slice %14 {offsets = [8, 14], sizes = [8, 10], strides = [1, 1]} : vector<32x98xf32> to vector<8x10xf32>
    %57 = vector.extract_strided_slice %14 {offsets = [0, 16], sizes = [8, 10], strides = [1, 1]} : vector<32x98xf32> to vector<8x10xf32>
    %58 = vector.extract_strided_slice %14 {offsets = [8, 16], sizes = [8, 10], strides = [1, 1]} : vector<32x98xf32> to vector<8x10xf32>
    %59 = vector.extract_strided_slice %14 {offsets = [0, 18], sizes = [8, 10], strides = [1, 1]} : vector<32x98xf32> to vector<8x10xf32>
    %60 = vector.extract_strided_slice %14 {offsets = [8, 18], sizes = [8, 10], strides = [1, 1]} : vector<32x98xf32> to vector<8x10xf32>
    %61 = vector.extract_strided_slice %14 {offsets = [16, 14], sizes = [8, 10], strides = [1, 1]} : vector<32x98xf32> to vector<8x10xf32>
    %62 = vector.extract_strided_slice %14 {offsets = [24, 14], sizes = [8, 10], strides = [1, 1]} : vector<32x98xf32> to vector<8x10xf32>
    %63 = vector.extract_strided_slice %14 {offsets = [16, 16], sizes = [8, 10], strides = [1, 1]} : vector<32x98xf32> to vector<8x10xf32>
    %64 = vector.extract_strided_slice %14 {offsets = [24, 16], sizes = [8, 10], strides = [1, 1]} : vector<32x98xf32> to vector<8x10xf32>
    %65 = vector.extract_strided_slice %14 {offsets = [16, 18], sizes = [8, 10], strides = [1, 1]} : vector<32x98xf32> to vector<8x10xf32>
    %66 = vector.extract_strided_slice %14 {offsets = [24, 18], sizes = [8, 10], strides = [1, 1]} : vector<32x98xf32> to vector<8x10xf32>
    %67 = vector.extract_strided_slice %14 {offsets = [0, 28], sizes = [8, 10], strides = [1, 1]} : vector<32x98xf32> to vector<8x10xf32>
    %68 = vector.extract_strided_slice %14 {offsets = [8, 28], sizes = [8, 10], strides = [1, 1]} : vector<32x98xf32> to vector<8x10xf32>
    %69 = vector.extract_strided_slice %14 {offsets = [0, 30], sizes = [8, 10], strides = [1, 1]} : vector<32x98xf32> to vector<8x10xf32>
    %70 = vector.extract_strided_slice %14 {offsets = [8, 30], sizes = [8, 10], strides = [1, 1]} : vector<32x98xf32> to vector<8x10xf32>
    %71 = vector.extract_strided_slice %14 {offsets = [0, 32], sizes = [8, 10], strides = [1, 1]} : vector<32x98xf32> to vector<8x10xf32>
    %72 = vector.extract_strided_slice %14 {offsets = [8, 32], sizes = [8, 10], strides = [1, 1]} : vector<32x98xf32> to vector<8x10xf32>
    %73 = vector.extract_strided_slice %14 {offsets = [16, 28], sizes = [8, 10], strides = [1, 1]} : vector<32x98xf32> to vector<8x10xf32>
    %74 = vector.extract_strided_slice %14 {offsets = [24, 28], sizes = [8, 10], strides = [1, 1]} : vector<32x98xf32> to vector<8x10xf32>
    %75 = vector.extract_strided_slice %14 {offsets = [16, 30], sizes = [8, 10], strides = [1, 1]} : vector<32x98xf32> to vector<8x10xf32>
    %76 = vector.extract_strided_slice %14 {offsets = [24, 30], sizes = [8, 10], strides = [1, 1]} : vector<32x98xf32> to vector<8x10xf32>
    %77 = vector.extract_strided_slice %14 {offsets = [16, 32], sizes = [8, 10], strides = [1, 1]} : vector<32x98xf32> to vector<8x10xf32>
    %78 = vector.extract_strided_slice %14 {offsets = [24, 32], sizes = [8, 10], strides = [1, 1]} : vector<32x98xf32> to vector<8x10xf32>
    %79 = vector.extract_strided_slice %14 {offsets = [0, 42], sizes = [8, 10], strides = [1, 1]} : vector<32x98xf32> to vector<8x10xf32>
    %80 = vector.extract_strided_slice %14 {offsets = [8, 42], sizes = [8, 10], strides = [1, 1]} : vector<32x98xf32> to vector<8x10xf32>
    %81 = vector.extract_strided_slice %14 {offsets = [0, 44], sizes = [8, 10], strides = [1, 1]} : vector<32x98xf32> to vector<8x10xf32>
    %82 = vector.extract_strided_slice %14 {offsets = [8, 44], sizes = [8, 10], strides = [1, 1]} : vector<32x98xf32> to vector<8x10xf32>
    %83 = vector.extract_strided_slice %14 {offsets = [0, 46], sizes = [8, 10], strides = [1, 1]} : vector<32x98xf32> to vector<8x10xf32>
    %84 = vector.extract_strided_slice %14 {offsets = [8, 46], sizes = [8, 10], strides = [1, 1]} : vector<32x98xf32> to vector<8x10xf32>
    %85 = vector.extract_strided_slice %14 {offsets = [16, 42], sizes = [8, 10], strides = [1, 1]} : vector<32x98xf32> to vector<8x10xf32>
    %86 = vector.extract_strided_slice %14 {offsets = [24, 42], sizes = [8, 10], strides = [1, 1]} : vector<32x98xf32> to vector<8x10xf32>
    %87 = vector.extract_strided_slice %14 {offsets = [16, 44], sizes = [8, 10], strides = [1, 1]} : vector<32x98xf32> to vector<8x10xf32>
    %88 = vector.extract_strided_slice %14 {offsets = [24, 44], sizes = [8, 10], strides = [1, 1]} : vector<32x98xf32> to vector<8x10xf32>
    %89 = vector.extract_strided_slice %14 {offsets = [16, 46], sizes = [8, 10], strides = [1, 1]} : vector<32x98xf32> to vector<8x10xf32>
    %90 = vector.extract_strided_slice %14 {offsets = [24, 46], sizes = [8, 10], strides = [1, 1]} : vector<32x98xf32> to vector<8x10xf32>
    %91 = tpu.concatenate %55, %56, %57, %58, %59, %60, %61, %62, %63, %64, %65, %66, %67, %68, %69, %70 in 0 : vector<8x10xf32>, vector<8x10xf32>, vector<8x10xf32>, vector<8x10xf32>, vector<8x10xf32>, vector<8x10xf32>, vector<8x10xf32>, vector<8x10xf32>, vector<8x10xf32>, vector<8x10xf32>, vector<8x10xf32>, vector<8x10xf32>, vector<8x10xf32>, vector<8x10xf32>, vector<8x10xf32>, vector<8x10xf32> -> vector<128x10xf32>
    %92 = tpu.concatenate %71, %72, %73, %74, %75, %76, %77, %78, %79, %80, %81, %82, %83, %84, %85, %86 in 0 : vector<8x10xf32>, vector<8x10xf32>, vector<8x10xf32>, vector<8x10xf32>, vector<8x10xf32>, vector<8x10xf32>, vector<8x10xf32>, vector<8x10xf32>, vector<8x10xf32>, vector<8x10xf32>, vector<8x10xf32>, vector<8x10xf32>, vector<8x10xf32>, vector<8x10xf32>, vector<8x10xf32>, vector<8x10xf32> -> vector<128x10xf32>
    %93 = tpu.concatenate %87, %88, %89, %90 in 0 : vector<8x10xf32>, vector<8x10xf32>, vector<8x10xf32>, vector<8x10xf32> -> vector<32x10xf32>
    %94 = tpu.concatenate %91, %92, %93 in 0 : vector<128x10xf32>, vector<128x10xf32>, vector<32x10xf32> -> vector<288x10xf32>
    %95 = vector.extract_strided_slice %14 {offsets = [0, 28], sizes = [8, 10], strides = [1, 1]} : vector<32x98xf32> to vector<8x10xf32>
    %96 = vector.extract_strided_slice %14 {offsets = [8, 28], sizes = [8, 10], strides = [1, 1]} : vector<32x98xf32> to vector<8x10xf32>
    %97 = vector.extract_strided_slice %14 {offsets = [0, 30], sizes = [8, 10], strides = [1, 1]} : vector<32x98xf32> to vector<8x10xf32>
    %98 = vector.extract_strided_slice %14 {offsets = [8, 30], sizes = [8, 10], strides = [1, 1]} : vector<32x98xf32> to vector<8x10xf32>
    %99 = vector.extract_strided_slice %14 {offsets = [0, 32], sizes = [8, 10], strides = [1, 1]} : vector<32x98xf32> to vector<8x10xf32>
    %100 = vector.extract_strided_slice %14 {offsets = [8, 32], sizes = [8, 10], strides = [1, 1]} : vector<32x98xf32> to vector<8x10xf32>
    %101 = vector.extract_strided_slice %14 {offsets = [16, 28], sizes = [8, 10], strides = [1, 1]} : vector<32x98xf32> to vector<8x10xf32>
    %102 = vector.extract_strided_slice %14 {offsets = [24, 28], sizes = [8, 10], strides = [1, 1]} : vector<32x98xf32> to vector<8x10xf32>
    %103 = vector.extract_strided_slice %14 {offsets = [16, 30], sizes = [8, 10], strides = [1, 1]} : vector<32x98xf32> to vector<8x10xf32>
    %104 = vector.extract_strided_slice %14 {offsets = [24, 30], sizes = [8, 10], strides = [1, 1]} : vector<32x98xf32> to vector<8x10xf32>
    %105 = vector.extract_strided_slice %14 {offsets = [16, 32], sizes = [8, 10], strides = [1, 1]} : vector<32x98xf32> to vector<8x10xf32>
    %106 = vector.extract_strided_slice %14 {offsets = [24, 32], sizes = [8, 10], strides = [1, 1]} : vector<32x98xf32> to vector<8x10xf32>
    %107 = vector.extract_strided_slice %14 {offsets = [0, 42], sizes = [8, 10], strides = [1, 1]} : vector<32x98xf32> to vector<8x10xf32>
    %108 = vector.extract_strided_slice %14 {offsets = [8, 42], sizes = [8, 10], strides = [1, 1]} : vector<32x98xf32> to vector<8x10xf32>
    %109 = vector.extract_strided_slice %14 {offsets = [0, 44], sizes = [8, 10], strides = [1, 1]} : vector<32x98xf32> to vector<8x10xf32>
    %110 = vector.extract_strided_slice %14 {offsets = [8, 44], sizes = [8, 10], strides = [1, 1]} : vector<32x98xf32> to vector<8x10xf32>
    %111 = vector.extract_strided_slice %14 {offsets = [0, 46], sizes = [8, 10], strides = [1, 1]} : vector<32x98xf32> to vector<8x10xf32>
    %112 = vector.extract_strided_slice %14 {offsets = [8, 46], sizes = [8, 10], strides = [1, 1]} : vector<32x98xf32> to vector<8x10xf32>
    %113 = vector.extract_strided_slice %14 {offsets = [16, 42], sizes = [8, 10], strides = [1, 1]} : vector<32x98xf32> to vector<8x10xf32>
    %114 = vector.extract_strided_slice %14 {offsets = [24, 42], sizes = [8, 10], strides = [1, 1]} : vector<32x98xf32> to vector<8x10xf32>
    %115 = vector.extract_strided_slice %14 {offsets = [16, 44], sizes = [8, 10], strides = [1, 1]} : vector<32x98xf32> to vector<8x10xf32>
    %116 = vector.extract_strided_slice %14 {offsets = [24, 44], sizes = [8, 10], strides = [1, 1]} : vector<32x98xf32> to vector<8x10xf32>
    %117 = vector.extract_strided_slice %14 {offsets = [16, 46], sizes = [8, 10], strides = [1, 1]} : vector<32x98xf32> to vector<8x10xf32>
    %118 = vector.extract_strided_slice %14 {offsets = [24, 46], sizes = [8, 10], strides = [1, 1]} : vector<32x98xf32> to vector<8x10xf32>
    %119 = vector.extract_strided_slice %14 {offsets = [0, 56], sizes = [8, 10], strides = [1, 1]} : vector<32x98xf32> to vector<8x10xf32>
    %120 = vector.extract_strided_slice %14 {offsets = [8, 56], sizes = [8, 10], strides = [1, 1]} : vector<32x98xf32> to vector<8x10xf32>
    %121 = vector.extract_strided_slice %14 {offsets = [0, 58], sizes = [8, 10], strides = [1, 1]} : vector<32x98xf32> to vector<8x10xf32>
    %122 = vector.extract_strided_slice %14 {offsets = [8, 58], sizes = [8, 10], strides = [1, 1]} : vector<32x98xf32> to vector<8x10xf32>
    %123 = vector.extract_strided_slice %14 {offsets = [0, 60], sizes = [8, 10], strides = [1, 1]} : vector<32x98xf32> to vector<8x10xf32>
    %124 = vector.extract_strided_slice %14 {offsets = [8, 60], sizes = [8, 10], strides = [1, 1]} : vector<32x98xf32> to vector<8x10xf32>
    %125 = vector.extract_strided_slice %14 {offsets = [16, 56], sizes = [8, 10], strides = [1, 1]} : vector<32x98xf32> to vector<8x10xf32>
    %126 = vector.extract_strided_slice %14 {offsets = [24, 56], sizes = [8, 10], strides = [1, 1]} : vector<32x98xf32> to vector<8x10xf32>
    %127 = vector.extract_strided_slice %14 {offsets = [16, 58], sizes = [8, 10], strides = [1, 1]} : vector<32x98xf32> to vector<8x10xf32>
    %128 = vector.extract_strided_slice %14 {offsets = [24, 58], sizes = [8, 10], strides = [1, 1]} : vector<32x98xf32> to vector<8x10xf32>
    %129 = vector.extract_strided_slice %14 {offsets = [16, 60], sizes = [8, 10], strides = [1, 1]} : vector<32x98xf32> to vector<8x10xf32>
    %130 = vector.extract_strided_slice %14 {offsets = [24, 60], sizes = [8, 10], strides = [1, 1]} : vector<32x98xf32> to vector<8x10xf32>
    %131 = tpu.concatenate %95, %96, %97, %98, %99, %100, %101, %102, %103, %104, %105, %106, %107, %108, %109, %110 in 0 : vector<8x10xf32>, vector<8x10xf32>, vector<8x10xf32>, vector<8x10xf32>, vector<8x10xf32>, vector<8x10xf32>, vector<8x10xf32>, vector<8x10xf32>, vector<8x10xf32>, vector<8x10xf32>, vector<8x10xf32>, vector<8x10xf32>, vector<8x10xf32>, vector<8x10xf32>, vector<8x10xf32>, vector<8x10xf32> -> vector<128x10xf32>
    %132 = tpu.concatenate %111, %112, %113, %114, %115, %116, %117, %118, %119, %120, %121, %122, %123, %124, %125, %126 in 0 : vector<8x10xf32>, vector<8x10xf32>, vector<8x10xf32>, vector<8x10xf32>, vector<8x10xf32>, vector<8x10xf32>, vector<8x10xf32>, vector<8x10xf32>, vector<8x10xf32>, vector<8x10xf32>, vector<8x10xf32>, vector<8x10xf32>, vector<8x10xf32>, vector<8x10xf32>, vector<8x10xf32>, vector<8x10xf32> -> vector<128x10xf32>
    %133 = tpu.concatenate %127, %128, %129, %130 in 0 : vector<8x10xf32>, vector<8x10xf32>, vector<8x10xf32>, vector<8x10xf32> -> vector<32x10xf32>
    %134 = tpu.concatenate %131, %132, %133 in 0 : vector<128x10xf32>, vector<128x10xf32>, vector<32x10xf32> -> vector<288x10xf32>
    %135 = vector.extract_strided_slice %14 {offsets = [0, 42], sizes = [8, 10], strides = [1, 1]} : vector<32x98xf32> to vector<8x10xf32>
    %136 = vector.extract_strided_slice %14 {offsets = [8, 42], sizes = [8, 10], strides = [1, 1]} : vector<32x98xf32> to vector<8x10xf32>
    %137 = vector.extract_strided_slice %14 {offsets = [0, 44], sizes = [8, 10], strides = [1, 1]} : vector<32x98xf32> to vector<8x10xf32>
    %138 = vector.extract_strided_slice %14 {offsets = [8, 44], sizes = [8, 10], strides = [1, 1]} : vector<32x98xf32> to vector<8x10xf32>
    %139 = vector.extract_strided_slice %14 {offsets = [0, 46], sizes = [8, 10], strides = [1, 1]} : vector<32x98xf32> to vector<8x10xf32>
    %140 = vector.extract_strided_slice %14 {offsets = [8, 46], sizes = [8, 10], strides = [1, 1]} : vector<32x98xf32> to vector<8x10xf32>
    %141 = vector.extract_strided_slice %14 {offsets = [16, 42], sizes = [8, 10], strides = [1, 1]} : vector<32x98xf32> to vector<8x10xf32>
    %142 = vector.extract_strided_slice %14 {offsets = [24, 42], sizes = [8, 10], strides = [1, 1]} : vector<32x98xf32> to vector<8x10xf32>
    %143 = vector.extract_strided_slice %14 {offsets = [16, 44], sizes = [8, 10], strides = [1, 1]} : vector<32x98xf32> to vector<8x10xf32>
    %144 = vector.extract_strided_slice %14 {offsets = [24, 44], sizes = [8, 10], strides = [1, 1]} : vector<32x98xf32> to vector<8x10xf32>
    %145 = vector.extract_strided_slice %14 {offsets = [16, 46], sizes = [8, 10], strides = [1, 1]} : vector<32x98xf32> to vector<8x10xf32>
    %146 = vector.extract_strided_slice %14 {offsets = [24, 46], sizes = [8, 10], strides = [1, 1]} : vector<32x98xf32> to vector<8x10xf32>
    %147 = vector.extract_strided_slice %14 {offsets = [0, 56], sizes = [8, 10], strides = [1, 1]} : vector<32x98xf32> to vector<8x10xf32>
    %148 = vector.extract_strided_slice %14 {offsets = [8, 56], sizes = [8, 10], strides = [1, 1]} : vector<32x98xf32> to vector<8x10xf32>
    %149 = vector.extract_strided_slice %14 {offsets = [0, 58], sizes = [8, 10], strides = [1, 1]} : vector<32x98xf32> to vector<8x10xf32>
    %150 = vector.extract_strided_slice %14 {offsets = [8, 58], sizes = [8, 10], strides = [1, 1]} : vector<32x98xf32> to vector<8x10xf32>
    %151 = vector.extract_strided_slice %14 {offsets = [0, 60], sizes = [8, 10], strides = [1, 1]} : vector<32x98xf32> to vector<8x10xf32>
    %152 = vector.extract_strided_slice %14 {offsets = [8, 60], sizes = [8, 10], strides = [1, 1]} : vector<32x98xf32> to vector<8x10xf32>
    %153 = vector.extract_strided_slice %14 {offsets = [16, 56], sizes = [8, 10], strides = [1, 1]} : vector<32x98xf32> to vector<8x10xf32>
    %154 = vector.extract_strided_slice %14 {offsets = [24, 56], sizes = [8, 10], strides = [1, 1]} : vector<32x98xf32> to vector<8x10xf32>
    %155 = vector.extract_strided_slice %14 {offsets = [16, 58], sizes = [8, 10], strides = [1, 1]} : vector<32x98xf32> to vector<8x10xf32>
    %156 = vector.extract_strided_slice %14 {offsets = [24, 58], sizes = [8, 10], strides = [1, 1]} : vector<32x98xf32> to vector<8x10xf32>
    %157 = vector.extract_strided_slice %14 {offsets = [16, 60], sizes = [8, 10], strides = [1, 1]} : vector<32x98xf32> to vector<8x10xf32>
    %158 = vector.extract_strided_slice %14 {offsets = [24, 60], sizes = [8, 10], strides = [1, 1]} : vector<32x98xf32> to vector<8x10xf32>
    %159 = vector.extract_strided_slice %14 {offsets = [0, 70], sizes = [8, 10], strides = [1, 1]} : vector<32x98xf32> to vector<8x10xf32>
    %160 = vector.extract_strided_slice %14 {offsets = [8, 70], sizes = [8, 10], strides = [1, 1]} : vector<32x98xf32> to vector<8x10xf32>
    %161 = vector.extract_strided_slice %14 {offsets = [0, 72], sizes = [8, 10], strides = [1, 1]} : vector<32x98xf32> to vector<8x10xf32>
    %162 = vector.extract_strided_slice %14 {offsets = [8, 72], sizes = [8, 10], strides = [1, 1]} : vector<32x98xf32> to vector<8x10xf32>
    %163 = vector.extract_strided_slice %14 {offsets = [0, 74], sizes = [8, 10], strides = [1, 1]} : vector<32x98xf32> to vector<8x10xf32>
    %164 = vector.extract_strided_slice %14 {offsets = [8, 74], sizes = [8, 10], strides = [1, 1]} : vector<32x98xf32> to vector<8x10xf32>
    %165 = vector.extract_strided_slice %14 {offsets = [16, 70], sizes = [8, 10], strides = [1, 1]} : vector<32x98xf32> to vector<8x10xf32>
    %166 = vector.extract_strided_slice %14 {offsets = [24, 70], sizes = [8, 10], strides = [1, 1]} : vector<32x98xf32> to vector<8x10xf32>
    %167 = vector.extract_strided_slice %14 {offsets = [16, 72], sizes = [8, 10], strides = [1, 1]} : vector<32x98xf32> to vector<8x10xf32>
    %168 = vector.extract_strided_slice %14 {offsets = [24, 72], sizes = [8, 10], strides = [1, 1]} : vector<32x98xf32> to vector<8x10xf32>
    %169 = vector.extract_strided_slice %14 {offsets = [16, 74], sizes = [8, 10], strides = [1, 1]} : vector<32x98xf32> to vector<8x10xf32>
    %170 = vector.extract_strided_slice %14 {offsets = [24, 74], sizes = [8, 10], strides = [1, 1]} : vector<32x98xf32> to vector<8x10xf32>
    %171 = tpu.concatenate %135, %136, %137, %138, %139, %140, %141, %142, %143, %144, %145, %146, %147, %148, %149, %150 in 0 : vector<8x10xf32>, vector<8x10xf32>, vector<8x10xf32>, vector<8x10xf32>, vector<8x10xf32>, vector<8x10xf32>, vector<8x10xf32>, vector<8x10xf32>, vector<8x10xf32>, vector<8x10xf32>, vector<8x10xf32>, vector<8x10xf32>, vector<8x10xf32>, vector<8x10xf32>, vector<8x10xf32>, vector<8x10xf32> -> vector<128x10xf32>
    %172 = tpu.concatenate %151, %152, %153, %154, %155, %156, %157, %158, %159, %160, %161, %162, %163, %164, %165, %166 in 0 : vector<8x10xf32>, vector<8x10xf32>, vector<8x10xf32>, vector<8x10xf32>, vector<8x10xf32>, vector<8x10xf32>, vector<8x10xf32>, vector<8x10xf32>, vector<8x10xf32>, vector<8x10xf32>, vector<8x10xf32>, vector<8x10xf32>, vector<8x10xf32>, vector<8x10xf32>, vector<8x10xf32>, vector<8x10xf32> -> vector<128x10xf32>
    %173 = tpu.concatenate %167, %168, %169, %170 in 0 : vector<8x10xf32>, vector<8x10xf32>, vector<8x10xf32>, vector<8x10xf32> -> vector<32x10xf32>
    %174 = tpu.concatenate %171, %172, %173 in 0 : vector<128x10xf32>, vector<128x10xf32>, vector<32x10xf32> -> vector<288x10xf32>
    %175 = vector.extract_strided_slice %14 {offsets = [0, 56], sizes = [8, 10], strides = [1, 1]} : vector<32x98xf32> to vector<8x10xf32>
    %176 = vector.extract_strided_slice %14 {offsets = [8, 56], sizes = [8, 10], strides = [1, 1]} : vector<32x98xf32> to vector<8x10xf32>
    %177 = vector.extract_strided_slice %14 {offsets = [0, 58], sizes = [8, 10], strides = [1, 1]} : vector<32x98xf32> to vector<8x10xf32>
    %178 = vector.extract_strided_slice %14 {offsets = [8, 58], sizes = [8, 10], strides = [1, 1]} : vector<32x98xf32> to vector<8x10xf32>
    %179 = vector.extract_strided_slice %14 {offsets = [0, 60], sizes = [8, 10], strides = [1, 1]} : vector<32x98xf32> to vector<8x10xf32>
    %180 = vector.extract_strided_slice %14 {offsets = [8, 60], sizes = [8, 10], strides = [1, 1]} : vector<32x98xf32> to vector<8x10xf32>
    %181 = vector.extract_strided_slice %14 {offsets = [16, 56], sizes = [8, 10], strides = [1, 1]} : vector<32x98xf32> to vector<8x10xf32>
    %182 = vector.extract_strided_slice %14 {offsets = [24, 56], sizes = [8, 10], strides = [1, 1]} : vector<32x98xf32> to vector<8x10xf32>
    %183 = vector.extract_strided_slice %14 {offsets = [16, 58], sizes = [8, 10], strides = [1, 1]} : vector<32x98xf32> to vector<8x10xf32>
    %184 = vector.extract_strided_slice %14 {offsets = [24, 58], sizes = [8, 10], strides = [1, 1]} : vector<32x98xf32> to vector<8x10xf32>
    %185 = vector.extract_strided_slice %14 {offsets = [16, 60], sizes = [8, 10], strides = [1, 1]} : vector<32x98xf32> to vector<8x10xf32>
    %186 = vector.extract_strided_slice %14 {offsets = [24, 60], sizes = [8, 10], strides = [1, 1]} : vector<32x98xf32> to vector<8x10xf32>
    %187 = vector.extract_strided_slice %14 {offsets = [0, 70], sizes = [8, 10], strides = [1, 1]} : vector<32x98xf32> to vector<8x10xf32>
    %188 = vector.extract_strided_slice %14 {offsets = [8, 70], sizes = [8, 10], strides = [1, 1]} : vector<32x98xf32> to vector<8x10xf32>
    %189 = vector.extract_strided_slice %14 {offsets = [0, 72], sizes = [8, 10], strides = [1, 1]} : vector<32x98xf32> to vector<8x10xf32>
    %190 = vector.extract_strided_slice %14 {offsets = [8, 72], sizes = [8, 10], strides = [1, 1]} : vector<32x98xf32> to vector<8x10xf32>
    %191 = vector.extract_strided_slice %14 {offsets = [0, 74], sizes = [8, 10], strides = [1, 1]} : vector<32x98xf32> to vector<8x10xf32>
    %192 = vector.extract_strided_slice %14 {offsets = [8, 74], sizes = [8, 10], strides = [1, 1]} : vector<32x98xf32> to vector<8x10xf32>
    %193 = vector.extract_strided_slice %14 {offsets = [16, 70], sizes = [8, 10], strides = [1, 1]} : vector<32x98xf32> to vector<8x10xf32>
    %194 = vector.extract_strided_slice %14 {offsets = [24, 70], sizes = [8, 10], strides = [1, 1]} : vector<32x98xf32> to vector<8x10xf32>
    %195 = vector.extract_strided_slice %14 {offsets = [16, 72], sizes = [8, 10], strides = [1, 1]} : vector<32x98xf32> to vector<8x10xf32>
    %196 = vector.extract_strided_slice %14 {offsets = [24, 72], sizes = [8, 10], strides = [1, 1]} : vector<32x98xf32> to vector<8x10xf32>
    %197 = vector.extract_strided_slice %14 {offsets = [16, 74], sizes = [8, 10], strides = [1, 1]} : vector<32x98xf32> to vector<8x10xf32>
    %198 = vector.extract_strided_slice %14 {offsets = [24, 74], sizes = [8, 10], strides = [1, 1]} : vector<32x98xf32> to vector<8x10xf32>
    %199 = vector.extract_strided_slice %14 {offsets = [0, 84], sizes = [8, 10], strides = [1, 1]} : vector<32x98xf32> to vector<8x10xf32>
    %200 = vector.extract_strided_slice %14 {offsets = [8, 84], sizes = [8, 10], strides = [1, 1]} : vector<32x98xf32> to vector<8x10xf32>
    %201 = vector.extract_strided_slice %14 {offsets = [0, 86], sizes = [8, 10], strides = [1, 1]} : vector<32x98xf32> to vector<8x10xf32>
    %202 = vector.extract_strided_slice %14 {offsets = [8, 86], sizes = [8, 10], strides = [1, 1]} : vector<32x98xf32> to vector<8x10xf32>
    %203 = vector.extract_strided_slice %14 {offsets = [0, 88], sizes = [8, 10], strides = [1, 1]} : vector<32x98xf32> to vector<8x10xf32>
    %204 = vector.extract_strided_slice %14 {offsets = [8, 88], sizes = [8, 10], strides = [1, 1]} : vector<32x98xf32> to vector<8x10xf32>
    %205 = vector.extract_strided_slice %14 {offsets = [16, 84], sizes = [8, 10], strides = [1, 1]} : vector<32x98xf32> to vector<8x10xf32>
    %206 = vector.extract_strided_slice %14 {offsets = [24, 84], sizes = [8, 10], strides = [1, 1]} : vector<32x98xf32> to vector<8x10xf32>
    %207 = vector.extract_strided_slice %14 {offsets = [16, 86], sizes = [8, 10], strides = [1, 1]} : vector<32x98xf32> to vector<8x10xf32>
    %208 = vector.extract_strided_slice %14 {offsets = [24, 86], sizes = [8, 10], strides = [1, 1]} : vector<32x98xf32> to vector<8x10xf32>
    %209 = vector.extract_strided_slice %14 {offsets = [16, 88], sizes = [8, 10], strides = [1, 1]} : vector<32x98xf32> to vector<8x10xf32>
    %210 = vector.extract_strided_slice %14 {offsets = [24, 88], sizes = [8, 10], strides = [1, 1]} : vector<32x98xf32> to vector<8x10xf32>
    %211 = tpu.concatenate %175, %176, %177, %178, %179, %180, %181, %182, %183, %184, %185, %186, %187, %188, %189, %190 in 0 : vector<8x10xf32>, vector<8x10xf32>, vector<8x10xf32>, vector<8x10xf32>, vector<8x10xf32>, vector<8x10xf32>, vector<8x10xf32>, vector<8x10xf32>, vector<8x10xf32>, vector<8x10xf32>, vector<8x10xf32>, vector<8x10xf32>, vector<8x10xf32>, vector<8x10xf32>, vector<8x10xf32>, vector<8x10xf32> -> vector<128x10xf32>
    %212 = tpu.concatenate %191, %192, %193, %194, %195, %196, %197, %198, %199, %200, %201, %202, %203, %204, %205, %206 in 0 : vector<8x10xf32>, vector<8x10xf32>, vector<8x10xf32>, vector<8x10xf32>, vector<8x10xf32>, vector<8x10xf32>, vector<8x10xf32>, vector<8x10xf32>, vector<8x10xf32>, vector<8x10xf32>, vector<8x10xf32>, vector<8x10xf32>, vector<8x10xf32>, vector<8x10xf32>, vector<8x10xf32>, vector<8x10xf32> -> vector<128x10xf32>
    %213 = tpu.concatenate %207, %208, %209, %210 in 0 : vector<8x10xf32>, vector<8x10xf32>, vector<8x10xf32>, vector<8x10xf32> -> vector<32x10xf32>
    %214 = tpu.concatenate %211, %212, %213 in 0 : vector<128x10xf32>, vector<128x10xf32>, vector<32x10xf32> -> vector<288x10xf32>
    %215 = tpu.concatenate %54, %94, %134, %174, %214 in 1 : vector<288x10xf32>, vector<288x10xf32>, vector<288x10xf32>, vector<288x10xf32>, vector<288x10xf32> -> vector<288x50xf32>
    %c0_6 = arith.constant 0 : index
    %c0_7 = arith.constant 0 : index
    %216 = vector.load %arg3[%c0_6, %c0_7] : memref<64x288xf32, #tpu.memory_space<vmem>>, vector<64x288xf32>
    %cst_8 = arith.constant dense<0.000000e+00> : vector<64x50xf32>
    %217 = tpu.matmul %216, %215, %cst_8 {dimension_numbers = #tpu.dot_dimension_numbers<[1], [0], [0], [1], [0, 0, 1, 1], [], []>} : vector<64x288xf32>, vector<288x50xf32>, vector<64x50xf32> -> vector<64x50xf32>
    %218 = vector.extract_strided_slice %217 {offsets = [0, 0], sizes = [16, 50], strides = [1, 1]} : vector<64x50xf32> to vector<16x50xf32>
    %219 = vector.extract_strided_slice %217 {offsets = [16, 0], sizes = [16, 50], strides = [1, 1]} : vector<64x50xf32> to vector<16x50xf32>
    %220 = arith.maximumf %218, %219 : vector<16x50xf32>
    %221 = vector.extract_strided_slice %217 {offsets = [32, 0], sizes = [16, 50], strides = [1, 1]} : vector<64x50xf32> to vector<16x50xf32>
    %222 = vector.extract_strided_slice %217 {offsets = [48, 0], sizes = [16, 50], strides = [1, 1]} : vector<64x50xf32> to vector<16x50xf32>
    %223 = arith.maximumf %221, %222 : vector<16x50xf32>
    %224 = arith.maximumf %220, %223 : vector<16x50xf32>
    %c0_9 = arith.constant 0 : index
    %c0_10 = arith.constant 0 : index
    %225 = vector.load %arg4[%c0_9, %c0_10] : memref<16x1xf32, #tpu.memory_space<vmem>>, vector<16x1xf32>
    %226 = vector.broadcast %225 : vector<16x1xf32> to vector<16x50xf32>
    %227 = arith.addf %224, %226 : vector<16x50xf32>
    %cst_11 = arith.constant 0.000000e+00 : f32
    %228 = vector.broadcast %cst_11 : f32 to vector<16x50xf32>
    %229 = arith.maximumf %227, %228 : vector<16x50xf32>
    %230 = vector.extract_strided_slice %229 {offsets = [0, 0], sizes = [16, 2], strides = [1, 1]} : vector<16x50xf32> to vector<16x2xf32>
    %231 = vector.extract_strided_slice %229 {offsets = [0, 2], sizes = [16, 2], strides = [1, 1]} : vector<16x50xf32> to vector<16x2xf32>
    %232 = vector.extract_strided_slice %229 {offsets = [0, 4], sizes = [16, 2], strides = [1, 1]} : vector<16x50xf32> to vector<16x2xf32>
    %233 = vector.extract_strided_slice %229 {offsets = [0, 6], sizes = [16, 2], strides = [1, 1]} : vector<16x50xf32> to vector<16x2xf32>
    %234 = vector.extract_strided_slice %229 {offsets = [0, 8], sizes = [16, 2], strides = [1, 1]} : vector<16x50xf32> to vector<16x2xf32>
    %235 = vector.extract_strided_slice %229 {offsets = [0, 10], sizes = [16, 2], strides = [1, 1]} : vector<16x50xf32> to vector<16x2xf32>
    %236 = vector.extract_strided_slice %229 {offsets = [0, 12], sizes = [16, 2], strides = [1, 1]} : vector<16x50xf32> to vector<16x2xf32>
    %237 = vector.extract_strided_slice %229 {offsets = [0, 14], sizes = [16, 2], strides = [1, 1]} : vector<16x50xf32> to vector<16x2xf32>
    %238 = vector.extract_strided_slice %229 {offsets = [0, 16], sizes = [16, 2], strides = [1, 1]} : vector<16x50xf32> to vector<16x2xf32>
    %239 = vector.extract_strided_slice %229 {offsets = [0, 18], sizes = [16, 2], strides = [1, 1]} : vector<16x50xf32> to vector<16x2xf32>
    %240 = vector.extract_strided_slice %229 {offsets = [0, 20], sizes = [16, 2], strides = [1, 1]} : vector<16x50xf32> to vector<16x2xf32>
    %241 = vector.extract_strided_slice %229 {offsets = [0, 22], sizes = [16, 2], strides = [1, 1]} : vector<16x50xf32> to vector<16x2xf32>
    %242 = vector.extract_strided_slice %229 {offsets = [0, 24], sizes = [16, 2], strides = [1, 1]} : vector<16x50xf32> to vector<16x2xf32>
    %243 = vector.extract_strided_slice %229 {offsets = [0, 26], sizes = [16, 2], strides = [1, 1]} : vector<16x50xf32> to vector<16x2xf32>
    %244 = vector.extract_strided_slice %229 {offsets = [0, 28], sizes = [16, 2], strides = [1, 1]} : vector<16x50xf32> to vector<16x2xf32>
    %245 = vector.extract_strided_slice %229 {offsets = [0, 30], sizes = [16, 2], strides = [1, 1]} : vector<16x50xf32> to vector<16x2xf32>
    %246 = vector.extract_strided_slice %229 {offsets = [0, 32], sizes = [16, 2], strides = [1, 1]} : vector<16x50xf32> to vector<16x2xf32>
    %247 = vector.extract_strided_slice %229 {offsets = [0, 34], sizes = [16, 2], strides = [1, 1]} : vector<16x50xf32> to vector<16x2xf32>
    %248 = vector.extract_strided_slice %229 {offsets = [0, 36], sizes = [16, 2], strides = [1, 1]} : vector<16x50xf32> to vector<16x2xf32>
    %249 = vector.extract_strided_slice %229 {offsets = [0, 38], sizes = [16, 2], strides = [1, 1]} : vector<16x50xf32> to vector<16x2xf32>
    %250 = vector.extract_strided_slice %229 {offsets = [0, 40], sizes = [16, 2], strides = [1, 1]} : vector<16x50xf32> to vector<16x2xf32>
    %251 = vector.extract_strided_slice %229 {offsets = [0, 42], sizes = [16, 2], strides = [1, 1]} : vector<16x50xf32> to vector<16x2xf32>
    %252 = vector.extract_strided_slice %229 {offsets = [0, 44], sizes = [16, 2], strides = [1, 1]} : vector<16x50xf32> to vector<16x2xf32>
    %253 = vector.extract_strided_slice %229 {offsets = [0, 46], sizes = [16, 2], strides = [1, 1]} : vector<16x50xf32> to vector<16x2xf32>
    %254 = vector.extract_strided_slice %229 {offsets = [0, 48], sizes = [16, 2], strides = [1, 1]} : vector<16x50xf32> to vector<16x2xf32>
    %255 = tpu.concatenate %230, %231, %232, %233, %234, %235, %236, %237, %238, %239, %240, %241, %242, %243, %244, %245 in 0 : vector<16x2xf32>, vector<16x2xf32>, vector<16x2xf32>, vector<16x2xf32>, vector<16x2xf32>, vector<16x2xf32>, vector<16x2xf32>, vector<16x2xf32>, vector<16x2xf32>, vector<16x2xf32>, vector<16x2xf32>, vector<16x2xf32>, vector<16x2xf32>, vector<16x2xf32>, vector<16x2xf32>, vector<16x2xf32> -> vector<256x2xf32>
    %256 = tpu.concatenate %246, %247, %248, %249, %250, %251, %252, %253, %254 in 0 : vector<16x2xf32>, vector<16x2xf32>, vector<16x2xf32>, vector<16x2xf32>, vector<16x2xf32>, vector<16x2xf32>, vector<16x2xf32>, vector<16x2xf32>, vector<16x2xf32> -> vector<144x2xf32>
    %257 = tpu.concatenate %255, %256 in 0 : vector<256x2xf32>, vector<144x2xf32> -> vector<400x2xf32>
    %c0_12 = arith.constant 0 : index
    %c0_13 = arith.constant 0 : index
    %258 = vector.load %arg5[%c0_12, %c0_13] : memref<120x400xf32, #tpu.memory_space<vmem>>, vector<120x400xf32>
    %cst_14 = arith.constant dense<0.000000e+00> : vector<120x2xf32>
    %259 = tpu.matmul %258, %257, %cst_14 {dimension_numbers = #tpu.dot_dimension_numbers<[1], [0], [0], [1], [0, 0, 1, 1], [], []>} : vector<120x400xf32>, vector<400x2xf32>, vector<120x2xf32> -> vector<120x2xf32>
    %c0_15 = arith.constant 0 : index
    %c0_16 = arith.constant 0 : index
    %260 = vector.load %arg6[%c0_15, %c0_16] : memref<120x1xf32, #tpu.memory_space<vmem>>, vector<120x1xf32>
    %261 = vector.broadcast %260 : vector<120x1xf32> to vector<120x2xf32>
    %262 = arith.addf %259, %261 : vector<120x2xf32>
    %c0_17 = arith.constant 0 : index
    %c0_18 = arith.constant 0 : index
    %263 = vector.load %arg7[%c0_17, %c0_18] : memref<84x120xf32, #tpu.memory_space<vmem>>, vector<84x120xf32>
    %cst_19 = arith.constant dense<0.000000e+00> : vector<84x2xf32>
    %264 = tpu.matmul %263, %262, %cst_19 {dimension_numbers = #tpu.dot_dimension_numbers<[1], [0], [0], [1], [0, 0, 1, 1], [], []>} : vector<84x120xf32>, vector<120x2xf32>, vector<84x2xf32> -> vector<84x2xf32>
    %c0_20 = arith.constant 0 : index
    %c0_21 = arith.constant 0 : index
    %265 = vector.load %arg8[%c0_20, %c0_21] : memref<84x1xf32, #tpu.memory_space<vmem>>, vector<84x1xf32>
    %266 = vector.broadcast %265 : vector<84x1xf32> to vector<84x2xf32>
    %267 = arith.addf %264, %266 : vector<84x2xf32>
    %c0_22 = arith.constant 0 : index
    %c0_23 = arith.constant 0 : index
    %268 = vector.load %arg9[%c0_22, %c0_23] : memref<10x84xf32, #tpu.memory_space<vmem>>, vector<10x84xf32>
    %cst_24 = arith.constant dense<0.000000e+00> : vector<10x2xf32>
    %269 = tpu.matmul %268, %267, %cst_24 {dimension_numbers = #tpu.dot_dimension_numbers<[1], [0], [0], [1], [0, 0, 1, 1], [], []>} : vector<10x84xf32>, vector<84x2xf32>, vector<10x2xf32> -> vector<10x2xf32>
    %c0_25 = arith.constant 0 : index
    %c0_26 = arith.constant 0 : index
    %270 = vector.load %arg10[%c0_25, %c0_26] : memref<10x1xf32, #tpu.memory_space<vmem>>, vector<10x1xf32>
    %271 = vector.broadcast %270 : vector<10x1xf32> to vector<10x2xf32>
    %272 = arith.addf %269, %271 : vector<10x2xf32>
    %cst_27 = arith.constant dense<0xFF800000> : vector<2xf32>
    %273 = vector.multi_reduction <maximumf>, %272, %cst_27 [0] : vector<10x2xf32> to vector<2xf32>
    %274 = vector.shape_cast %273 : vector<2xf32> to vector<1x2xf32>
    %275 = vector.broadcast %274 : vector<1x2xf32> to vector<10x2xf32>
    %276 = arith.subf %272, %275 : vector<10x2xf32>
    %277 = math.exp %276 : vector<10x2xf32>
    %cst_28 = arith.constant dense<0.000000e+00> : vector<2xf32>
    %278 = vector.multi_reduction <add>, %277, %cst_28 [0] : vector<10x2xf32> to vector<2xf32>
    %279 = vector.shape_cast %278 : vector<2xf32> to vector<1x2xf32>
    %280 = math.log %279 : vector<1x2xf32>
    %281 = vector.broadcast %280 : vector<1x2xf32> to vector<10x2xf32>
    %282 = arith.subf %276, %281 : vector<10x2xf32>
    %c0_29 = arith.constant 0 : index
    %c0_30 = arith.constant 0 : index
    %283 = vector.load %arg11[%c0_29, %c0_30] : memref<10x2xf32, #tpu.memory_space<vmem>>, vector<10x2xf32>
    tpu.vector_store %arg11[%c0_29, %c0_30], %282 {strides = array<i32>} : memref<10x2xf32, #tpu.memory_space<vmem>>, vector<10x2xf32>,
    return
  }
}

</mosaic_0001>

<bundles_post_ra>
// kernel: lenet5_forward.1
= control target key start
LH: loop header
LB: loop body
LE: loop exit
PB: predicated region body
PF: predicated region fallthrough
CT: control target
= control target key end

     0   :  { %vm62_vm0 = vcmask 523264   ;;  %v3408_v3 = vmov 0   ;;  %s3410_s12 = smov 118   ;;  %s3411_s13 = smov 110   ;;  %vm830_vm1 = vcmask 80896   ;;  %vm867_vm2 = vcmask 162816   ;;  %s4830_s0 = inlined_call_operand.vmem [shape: f32[64,98], index: 0, kind: input, shape index: {}]   ;;  %s4831_s1 = inlined_call_operand.vmem [shape: f32[128,64], index: 1, kind: input, shape index: {}]   ;;  %s4832_s2 = inlined_call_operand.vmem [shape: f32[32,1], index: 2, kind: input, shape index: {}]   ;;  %s4833_s3 = inlined_call_operand.vmem [shape: f32[64,288], index: 3, kind: input, shape index: {}]   ;;  %s4834_s4 = inlined_call_operand.vmem [shape: f32[16,1], index: 4, kind: input, shape index: {}]   ;;  %s4835_s5 = inlined_call_operand.vmem [shape: f32[120,400], index: 5, kind: input, shape index: {}]   ;;  %s4836_s6 = inlined_call_operand.vmem [shape: f32[120,1], index: 6, kind: input, shape index: {}]   ;;  %s4837_s8 = inlined_call_operand.vmem [shape: f32[84,1], index: 8, kind: input, shape index: {}]   ;;  %s4838_s10 = inlined_call_operand.vmem [shape: f32[10,1], index: 10, kind: input, shape index: {}]   ;;  %s4839_s7 = inlined_call_operand.vmem [shape: f32[84,120], index: 7, kind: input, shape index: {}]   ;;  %s4840_s9 = inlined_call_operand.vmem [shape: f32[10,84], index: 9, kind: input, shape index: {}]   ;;  %s4841_s11 = inlined_call_operand.vmem [shape: f32[10,2], index: 11, kind: output, shape index: {}]  }
   0x1   :  { %v54_v0 = vld [vmem:[%s4830_s0] sm:$0xff]  ;;  %v55_v1 = vld [vmem:[%s4830_s0 + $0x8] sm:$0xff]  ;;  %v56_v2 = vld [vmem:[%s4830_s0 + $0x10] sm:$0xff]  ;;  %2836 = vset.pattern.permute.xlu1 %v3408_v3  ;;  %2835 = vset.pattern.permute.xlu0 %v3408_v3  ;;  %s3412_s14 = smov 114   ;;  %s3413_s15 = smov 126   ;;  %vm904_vm3 = vcmask 244736  }
   0x2   :  { %v2657_v4 = vpack.c.bf16 %v55_v1, %v54_v0  ;;  %v57_v5 = vld [vmem:[%s4830_s0 + $0x18] sm:$0xff]  ;;  %v58_v7 = vld [vmem:[%s4830_s0 + $0x20] sm:$0xff]  ;;  %v59_v8 = vld [vmem:[%s4830_s0 + $0x28] sm:$0xff]  ;;  %s3414_s16 = smov 112   ;;  %s3415_s17 = smov 124   ;;  %vm941_vm4 = vcmask 326656  }
   0x3   :  { %v2661_v6 = vpack.c.bf16 %v57_v5, %v56_v2  ;;  %v38_v9 = vld [vmem:[%s4831_s1] sm:$0xff]  ;;  %v2665_v10 = vpack.c.bf16 %v59_v8, %v58_v7  ;;  %v60_v11 = vld [vmem:[%s4830_s0 + $0x30] sm:$0xff]  ;;  %v61_v12 = vld [vmem:[%s4830_s0 + $0x38] sm:$0xff]  ;;  %s3416_s18 = smov 4   ;;  %s3417_s19 = smov 2   ;;  %vm1002_vm5 = vcmask 261120  }
   0x4   :  { %2658 = vmatprep.subr.bf16.mxu0 %v2657_v4  ;;  %2525 = vmatprep.mubr.msk.f32.mxu0 %vm62_vm0, %v38_v9  ;;  %v268_v13 = vld [vmem:[%s4832_s2] sm:$0xff]  ;;  %v270_v14 = vld [vmem:[%s4832_s2 + $0x10] sm:$0xff]  ;;  %v2669_v15 = vpack.c.bf16 %v61_v12, %v60_v11  ;;  %v269_v16 = vld [vmem:[%s4832_s2 + $0x8] sm:$0xff]  ;;  %s3418_s20 = smov 120   ;;  %s3419_s21 = smov 98   ;;  %vm1555_vm6 = vcmask 130048  }
   0x5   :  { %2660 = vmatpush3.bf16.msra.mxu0 %v2657_v4  ;;  %274 = vperm.xlu1 %2836, %v268_v13   ;;  %v271_v17 = vld [vmem:[%s4832_s2 + $0x18] sm:$0xff]  ;;  %v39_v18 = vld [vmem:[%s4831_s1 + $0x8] sm:$0xff]  ;;  %v40_v19 = vld [vmem:[%s4831_s1 + $0x10] sm:$0xff]  ;;  %s3425_s29 = smov 104   ;;  %s3426_s30 = smov 102   ;;  %vm3428_vm7 = vmmov 0  }
   0x6   :  { %2662 = vmatprep.subr.bf16.mxu0 %v2661_v6  ;;  %284 = vperm.xlu0 %2835, %v270_v14   ;;  %v41_v20 = vld [vmem:[%s4831_s1 + $0x18] sm:$0xff]  ;;  %v42_v21 = vld [vmem:[%s4831_s1 + $0x20] sm:$0xff]  ;;  %v43_v22 = vld [vmem:[%s4831_s1 + $0x28] sm:$0xff]  ;;  %vm1958_vm8 = vcmask 982016   ;;  %vm2126_vm9 = vcmask 687104   ;;  %vm2133_vm10 = vcmask 1043456  }
   0x7   :  { %v44_v23 = vld [vmem:[%s4831_s1 + $0x30] sm:$0xff]  ;;  %v45_v24 = vld [vmem:[%s4831_s1 + $0x38] sm:$0xff]  ;;  %v46_v25 = vld [vmem:[%s4831_s1 + $0x40] sm:$0xff]  ;;  %vm2214_vm11 = vcmask 9216   ;;  %vm2212_vm12 = vcmask 15360  }
   0x8   :  { %v47_v26 = vld [vmem:[%s4831_s1 + $0x48] sm:$0xff]  ;;  %v48_v27 = vld [vmem:[%s4831_s1 + $0x50] sm:$0xff]  ;;  %v49_v28 = vld [vmem:[%s4831_s1 + $0x58] sm:$0xff] }
   0x9   :  { %2664 = vmatpush3.bf16.msra.mxu0 %v2661_v6  ;;  %279 = vperm.xlu1 %2836, %v269_v16   ;;  %v50_v29 = vld [vmem:[%s4831_s1 + $0x60] sm:$0xff]  ;;  %v51_v30 = vld [vmem:[%s4831_s1 + $0x68] sm:$0xff]  ;;  %v52_v31 = vld [vmem:[%s4831_s1 + $0x70] sm:$0xff] }
   0xa   :  { %2666 = vmatprep.subr.bf16.mxu0 %v2665_v10  ;;  %289 = vperm.xlu0 %2835, %v271_v17   ;;  %v53_v32 = vld [vmem:[%s4831_s1 + $0x78] sm:$0xff]  ;;  %s3409_s1 = smov 116  }
   0xd   :  { %2668 = vmatpush3.bf16.msra.mxu0 %v2665_v10 }
   0xe   :  { %2670 = vmatprep.subr.bf16.mxu0 %v2669_v15 }
  0x11   :  { %2672 = vmatpush3.bf16.msra.mxu0 %v2669_v15 }
  0x14   :  { %2526 = vmatmul.mubr.msk.f32.vlgmr.msra.gmra.mrb[0].mxu0 %vm62_vm0, %v39_v18 }
  0x15   :  { %2528 = vmatprep.mubr.msk.f32.mxu0 %vm62_vm0, %v40_v19 }
  0x18   :  { %2529 = vmatmul.mubr.msk.f32.gmra.mrb[2].mxu0 %vm62_vm0, %v41_v20 }
  0x19   :  { %2531 = vmatprep.mubr.msk.f32.mxu0 %vm62_vm0, %v42_v21 }
  0x1c   :  { %2532 = vmatmul.mubr.msk.f32.gmra.mrb[4].mxu0 %vm62_vm0, %v43_v22 }
  0x1d   :  { %2534 = vmatprep.mubr.msk.f32.mxu0 %vm62_vm0, %v44_v23 }
  0x20   :  { %2535 = vmatmul.mubr.msk.f32.gmra.mrb[6].mxu0 %vm62_vm0, %v45_v24 }
  0x21   :  { %2537 = vmatprep.mubr.msk.f32.mxu0 %vm62_vm0, %v46_v25 }
  0x24   :  { %2538 = vmatmul.mubr.msk.f32.gmra.mrb[8].mxu0 %vm62_vm0, %v47_v26 }
  0x25   :  { %2540 = vmatprep.mubr.msk.f32.mxu0 %vm62_vm0, %v48_v27 }
  0x28   :  { %2541 = vmatmul.mubr.msk.f32.gmra.mrb[10].mxu0 %vm62_vm0, %v49_v28 }
  0x29   :  { %2543 = vmatprep.mubr.msk.f32.mxu0 %vm62_vm0, %v50_v29 }
  0x2c   :  { %2544 = vmatmul.mubr.msk.f32.gmra.mrb[12].mxu0 %vm62_vm0, %v51_v30 }
  0x2d   :  { %2546 = vmatprep.mubr.msk.f32.mxu0 %vm62_vm0, %v52_v31 }
  0x30   :  { %2547 = vmatmul.mubr.msk.f32.gmra.mrb[14].mxu0 %vm62_vm0, %v53_v32 }
  0x84   :  { %v275_v49 = vpop.permute.xlu1 %274 }
  0x85   :  { %v285_v59 = vpop.permute.xlu0 %284 }
  0x88   :  { %v280_v55 = vpop.permute.xlu1 %279 }
  0x89   :  { %v290_v5 = vpop.permute.xlu0 %289 }
  0xe7   :  { %v2527_v33 = vpop.f32.mrb[0].mxu0 }
  0xe8   :  { %v177_v34 = vpop.f32.mrb[1].mxu0 }
  0xeb   :  { %v2530_v35 = vpop.f32.mrb[2].mxu0 }
  0xec   :  { %v187_v36 = vpop.f32.mrb[3].mxu0 }
  0xef   :  { %v2533_v37 = vpop.f32.mrb[4].mxu0 }
  0xf0   :  { %v257_v38 = vmax.f32 %v2527_v33, %v2533_v37  ;;  %v197_v39 = vpop.f32.mrb[5].mxu0 }
  0xf1   :  { %v256_v40 = vmax.f32 %v177_v34, %v197_v39 }
  0xf3   :  { %v2536_v41 = vpop.f32.mrb[6].mxu0 }
  0xf4   :  { %v259_v42 = vmax.f32 %v2530_v35, %v2536_v41  ;;  %v207_v43 = vpop.f32.mrb[7].mxu0 }
  0xf5   :  { %v258_v44 = vmax.f32 %v187_v36, %v207_v43 }
  0xf7   :  { %v2539_v45 = vpop.f32.mrb[8].mxu0 }
  0xf8   :  { %v217_v46 = vpop.f32.mrb[9].mxu0 }
  0xfb   :  { %v2542_v47 = vpop.f32.mrb[10].mxu0 }
  0xfc   :  { %v227_v48 = vpop.f32.mrb[11].mxu0 }
  0xff   :  { %v2545_v50 = vpop.f32.mrb[12].mxu0 }
 0x100   :  { %v261_v51 = vmax.f32 %v2539_v45, %v2545_v50  ;;  %v237_v52 = vpop.f32.mrb[13].mxu0 }
 0x101   :  { %v260_v53 = vmax.f32 %v217_v46, %v237_v52 }
 0x102   :  { %v265_v54 = vmax.f32 %v257_v38, %v261_v51 }
 0x103   :  { %v264_v56 = vmax.f32 %v256_v40, %v260_v53  ;;  %v2548_v57 = vpop.f32.mrb[14].mxu0 }
 0x104   :  { %v3590_v58 = vadd.f32 %v280_v55, %v265_v54  ;;  %v263_v60 = vmax.f32 %v2542_v47, %v2548_v57  ;;  %v247_v61 = vpop.f32.mrb[15].mxu0 }
 0x105   :  { %v3592_v62 = vadd.f32 %v275_v49, %v264_v56  ;;  %v262_v63 = vmax.f32 %v227_v48, %v247_v61 }
 0x106   :  { %v297_v0 = vmax.f32 %v3590_v58, 0.0  ;;  %v267_v1 = vmax.f32 %v259_v42, %v263_v60 }
 0x107   :  { %v296_v2 = vmax.f32 %v3592_v62, 0.0  ;;  %v266_v3 = vmax.f32 %v258_v44, %v262_v63 }
 0x108   :  { %v3604_v7 = vadd.f32 %v290_v5, %v267_v1 }
 0x109   :  { %v2842_v4 = vpack.i.bf16 %v297_v0, %v296_v2  ;;  %v3602_v6 = vadd.f32 %v285_v59, %v266_v3 }
 0x10a   :  { %v299_v9 = vmax.f32 %v3604_v7, 0.0 }
 0x10b   :  { %2843 = vrot.lane.b32.xlu1 %v2842_v4, %s3409_s1  ;;  %2838 = vrot.lane.b32.xlu0 %v2842_v4, %s3410_s12  ;;  %v298_v8 = vmax.f32 %v3602_v6, 0.0 }
 0x10d   :  { %v2872_v10 = vpack.i.bf16 %v299_v9, %v298_v8 }
 0x10f   :  { %2853 = vrot.lane.b32.xlu1 %v2842_v4, %s3411_s13  ;;  %2848 = vrot.lane.b32.xlu0 %v2842_v4, %s3412_s14 }
 0x113   :  { %2858 = vrot.lane.b32.xlu1 %v2842_v4, %s3413_s15  ;;  %2868 = vrot.lane.b32.xlu0 %v2842_v4, %s3414_s16 }
 0x117   :  { %2863 = vrot.lane.b32.xlu1 %v2842_v4, %s3415_s17  ;;  %2873 = vrot.lane.b32.xlu0 %v2872_v10, %s3416_s18 }
 0x11b   :  { %2878 = vrot.lane.b32.xlu1 %v2872_v10, %s3417_s19  ;;  %2893 = vrot.lane.b32.xlu0 %v2872_v10, %s3413_s15 }
 0x11f   :  { %2883 = vrot.lane.b32.xlu1 %v2842_v4, %s3418_s20  ;;  %2898 = vrot.lane.b32.xlu0 %v2872_v10, %s3411_s13 }
 0x123   :  { %2888 = vrot.lane.b32.xlu1 %v2872_v10, %s3410_s12  ;;  %2913 = vrot.lane.b32.xlu0 %v2872_v10, %s3418_s20 }
 0x127   :  { %2903 = vrot.lane.b32.xlu1 %v2872_v10, %s3415_s17  ;;  %2918 = vrot.lane.b32.xlu0 %v2872_v10, %s3409_s1 }
 0x12b   :  { %2908 = vrot.lane.b32.xlu1 %v2872_v10, %s3419_s21 }
 0x12f   :  { %2923 = vrot.lane.b32.xlu1 %v2872_v10, %s3414_s16 }
 0x17d   :  { %v2844_v11 = vpop.permute.xlu1 %2843  ;;  %v2839_v12 = vpop.permute.xlu0 %2838 }
 0x17e   :  { %v2846_v13 = vunpack.i.h.bf16 %v2844_v11  ;;  %v2845_v14 = vunpack.i.l.bf16 %v2844_v11  ;;  %2928 = vrot.lane.b32.xlu1 %v2839_v12, %s3411_s13  ;;  %2933 = vrot.lane.b32.xlu0 %v2844_v11, %s3411_s13 }
 0x181   :  { %v3626_v15 = vpop.permute.xlu1 %2853  ;;  %v3628_v16 = vpop.permute.xlu0 %2848 }
 0x182   :  { %v2856_v17 = vunpack.i.h.bf16 %v3626_v15  ;;  %v2855_v18 = vunpack.i.l.bf16 %v3626_v15  ;;  %2943 = vrot.lane.b32.xlu1 %v3626_v15, %s3415_s17  ;;  %2938 = vrot.lane.b32.xlu0 %v3628_v16, %s3411_s13 }
 0x185   :  { %v3636_v21 = vpop.permute.xlu1 %2858  ;;  %v3654_v26 = vpop.permute.xlu0 %2868 }
 0x186   :  { %v2861_v22 = vunpack.i.h.bf16 %v3636_v21  ;;  %v2860_v23 = vunpack.i.l.bf16 %v3636_v21  ;;  %2958 = vrot.lane.b32.xlu1 %v3626_v15, %s3414_s16  ;;  %2948 = vrot.lane.b32.xlu0 %v3626_v15, %s3418_s20  ;;  %v4843_v37 = vunpack.i.h.bf16 %v3654_v26  ;;  %v4842_v38 = vunpack.i.l.bf16 %v3654_v26 }
 0x189   :  { %v3644_v24 = vpop.permute.xlu1 %2863  ;;  %v2874_v34 = vpop.permute.xlu0 %2873 }
 0x18a   :  { %2963 = vrot.lane.b32.xlu1 %v3636_v21, %s3415_s17  ;;  %2953 = vrot.lane.b32.xlu0 %v3626_v15, %s3409_s1  ;;  %v4846_v27 = vunpack.i.h.bf16 %v3644_v24  ;;  %v2865_v28 = vunpack.i.l.bf16 %v3644_v24 }
 0x18c   :  { %v831_v32 = vsel %vm830_vm1, %v296_v2, %v2865_v28  ;;  %v832_v33 = vsel %vm830_vm1, %v297_v0, %v4846_v27 }
 0x18d   :  { %v2879_v25 = vpop.permute.xlu1 %2878  ;;  %v3698_v44 = vpop.permute.xlu0 %2893 }
 0x18e   :  { %2968 = vrot.lane.b32.xlu1 %v3636_v21, %s3418_s20  ;;  %2978 = vrot.lane.b32.xlu0 %v3636_v21, %s3414_s16 }
 0x191   :  { %v2884_v29 = vpop.permute.xlu1 %2883  ;;  %v3704_v46 = vpop.permute.xlu0 %2898 }
 0x192   :  { %v2886_v30 = vunpack.i.h.bf16 %v2884_v29  ;;  %v2885_v31 = vunpack.i.l.bf16 %v2884_v29  ;;  %2973 = vrot.lane.b32.xlu1 %v3636_v21, %s3409_s1  ;;  %2998 = vrot.lane.b32.xlu0 %v3644_v24, %s3414_s16 }
 0x194   :  { %v868_v35 = vsel %vm867_vm2, %v831_v32, %v2885_v31  ;;  %v869_v36 = vsel %vm867_vm2, %v832_v33, %v2886_v30 }
 0x195   :  { %v905_v39 = vsel %vm904_vm3, %v868_v35, %v2845_v14  ;;  %v906_v40 = vsel %vm904_vm3, %v869_v36, %v2846_v13  ;;  %v2889_v45 = vpop.permute.xlu1 %2888  ;;  %v3745_v54 = vpop.permute.xlu0 %2913 }
 0x196   :  { %v3685_v41 = vsel %vm941_vm4, %v905_v39, %v4842_v38  ;;  %v3690_v42 = vsel %vm941_vm4, %v906_v40, %v4843_v37  ;;  %2983 = vrot.lane.b32.xlu1 %v3644_v24, %s3415_s17  ;;  %3003 = vrot.lane.b32.xlu0 %v3628_v16, %s3415_s17  ;;  %v2915_v48 = vunpack.i.l.bf16 %v3745_v54 }
 0x197   :  { %v2675_v43 = vpack.c.bf16 %v3690_v42, %v3685_v41  ;;  %v2916_v41 = vunpack.i.h.bf16 %v3745_v54 }
 0x199   :  { %v3723_v51 = vpop.permute.xlu1 %2903  ;;  %v3749_v56 = vpop.permute.xlu0 %2918 }
 0x19a   :  { %2988 = vrot.lane.b32.xlu1 %v3644_v24, %s3418_s20  ;;  %3008 = vrot.lane.b32.xlu0 %v3628_v16, %s3418_s20  ;;  %v4845_v52 = vunpack.i.h.bf16 %v3723_v51  ;;  %v4844_v53 = vunpack.i.l.bf16 %v3723_v51  ;;  %v2921_v7 = vunpack.i.h.bf16 %v3749_v56 }
 0x19c   :  { %v837_v61 = vsel %vm830_vm1, %v298_v8, %v4844_v53  ;;  %v838_v42 = vsel %vm830_vm1, %v299_v9, %v4845_v52  ;;  %v2920_v9 = vunpack.i.l.bf16 %v3749_v56 }
 0x19d   :  { %v3747_v55 = vpop.permute.xlu1 %2908  ;;  %v874_v6 = vsel %vm867_vm2, %v837_v61, %v2915_v48  ;;  %v875_v8 = vsel %vm867_vm2, %v838_v42, %v2916_v41 }
 0x19e   :  { %2993 = vrot.lane.b32.xlu1 %v3644_v24, %s3409_s1  ;;  %3013 = vrot.lane.b32.xlu0 %v2874_v34, %s3411_s13  ;;  %v911_v27 = vsel %vm904_vm3, %v874_v6, %v2920_v9  ;;  %v912_v48 = vsel %vm904_vm3, %v875_v8, %v2921_v7 }
 0x1a1   :  { %v3751_v57 = vpop.permute.xlu1 %2923 }
 0x1a2   :  { %3023 = vrot.lane.b32.xlu1 %v2889_v45, %s3411_s13  ;;  %3018 = vrot.lane.b32.xlu0 %v2879_v25, %s3411_s13  ;;  %v2926_v50 = vunpack.i.h.bf16 %v3751_v57  ;;  %v2925_v49 = vunpack.i.l.bf16 %v3751_v57 }
 0x1a4   :  { %v3974_v56 = vsel %vm941_vm4, %v911_v27, %v2925_v49  ;;  %v3977_v42 = vsel %vm941_vm4, %v912_v48, %v2926_v50 }
 0x1a6   :  { %3033 = vrot.lane.b32.xlu1 %v3704_v46, %s3415_s17  ;;  %3028 = vrot.lane.b32.xlu0 %v3698_v44, %s3419_s21 }
 0x1aa   :  { %3038 = vrot.lane.b32.xlu1 %v3704_v46, %s3418_s20  ;;  %3053 = vrot.lane.b32.xlu0 %v3698_v44, %s3415_s17 }
 0x1ae   :  { %3043 = vrot.lane.b32.xlu1 %v3704_v46, %s3409_s1  ;;  %3058 = vrot.lane.b32.xlu0 %v3698_v44, %s3418_s20 }
 0x1b2   :  { %3048 = vrot.lane.b32.xlu1 %v3704_v46, %s3414_s16  ;;  %3063 = vrot.lane.b32.xlu0 %v3698_v44, %s3409_s1 }
 0x1b6   :  { %3068 = vrot.lane.b32.xlu1 %v3698_v44, %s3414_s16  ;;  %3073 = vrot.lane.b32.xlu0 %v3723_v51, %s3415_s17 }
 0x1ba   :  { %3088 = vrot.lane.b32.xlu1 %v3723_v51, %s3414_s16  ;;  %3078 = vrot.lane.b32.xlu0 %v3723_v51, %s3418_s20 }
 0x1be   :  { %3083 = vrot.lane.b32.xlu0 %v3723_v51, %s3409_s1 }
 0x1f0   :  { %v3753_v58 = vpop.permute.xlu1 %2928  ;;  %v3755_v59 = vpop.permute.xlu0 %2933 }
 0x1f1   :  { %3098 = vrot.lane.b32.xlu1 %v3753_v58, %s3418_s20  ;;  %3093 = vrot.lane.b32.xlu0 %v3753_v58, %s3415_s17 }
 0x1f4   :  { %v2944_v0 = vpop.permute.xlu1 %2943  ;;  %v3761_v1 = vpop.permute.xlu0 %2938 }
 0x1f5   :  { %v2946_v10 = vunpack.i.h.bf16 %v2944_v0  ;;  %v2945_v11 = vunpack.i.l.bf16 %v2944_v0  ;;  %3103 = vrot.lane.b32.xlu1 %v3753_v58, %s3409_s1  ;;  %3113 = vrot.lane.b32.xlu0 %v3755_v59, %s3415_s17 }
 0x1f7   :  { %v847_v31 = vsel %vm830_vm1, %v2855_v18, %v2945_v11  ;;  %v848_v32 = vsel %vm830_vm1, %v2856_v17, %v2946_v10 }
 0x1f8   :  { %v2959_v4 = vpop.permute.xlu1 %2958  ;;  %v2949_v5 = vpop.permute.xlu0 %2948 }
 0x1f9   :  { %v2951_v12 = vunpack.i.h.bf16 %v2949_v5  ;;  %v2950_v13 = vunpack.i.l.bf16 %v2949_v5  ;;  %3108 = vrot.lane.b32.xlu1 %v3753_v58, %s3414_s16  ;;  %3133 = vrot.lane.b32.xlu0 %v3761_v1, %s3415_s17  ;;  %v2961_v33 = vunpack.i.h.bf16 %v2959_v4  ;;  %v2960_v34 = vunpack.i.l.bf16 %v2959_v4 }
 0x1fb   :  { %v884_v35 = vsel %vm867_vm2, %v847_v31, %v2950_v13  ;;  %v885_v36 = vsel %vm867_vm2, %v848_v32, %v2951_v12 }
 0x1fc   :  { %v3773_v14 = vpop.permute.xlu1 %2963  ;;  %v2954_v25 = vpop.permute.xlu0 %2953 }
 0x1fd   :  { %v2956_v29 = vunpack.i.h.bf16 %v2954_v25  ;;  %v2955_v30 = vunpack.i.l.bf16 %v2954_v25  ;;  %3118 = vrot.lane.b32.xlu1 %v3755_v59, %s3418_s20  ;;  %v2965_v53 = vunpack.i.l.bf16 %v3773_v14  ;;  %v2966_v54 = vunpack.i.h.bf16 %v3773_v14 }
 0x1ff   :  { %v921_v39 = vsel %vm904_vm3, %v884_v35, %v2955_v30  ;;  %v922_v40 = vsel %vm904_vm3, %v885_v36, %v2956_v29  ;;  %v1244_v35 = vld [vmem:[%s4834_s4 + $0x8] sm:$0xff]  ;;  %v833_v14 = vsel %vm830_vm1, %v2860_v23, %v2965_v53 }
 0x200   :  { %v3789_v45 = vpop.permute.xlu0 %2978  ;;  %v958_v0 = vsel %vm941_vm4, %v921_v39, %v2960_v34  ;;  %v959_v18 = vsel %vm941_vm4, %v922_v40, %v2961_v33  ;;  %v3795_v15 = vpop.permute.xlu1 %2968  ;;  %v980_v40 = vld [vmem:[%s4833_s3 + $0x10] sm:$0xff] }
 0x201   :  { %v2673_v17 = vpack.c.bf16 %v959_v18, %v958_v0  ;;  %3123 = vrot.lane.b32.xlu1 %v3755_v59, %s3409_s1  ;;  %v979_v18 = vld [vmem:[%s4833_s3 + $0x8] sm:$0xff]  ;;  %2557 = vmatprep.mubr.msk.f32.mxu0 %vm1002_vm5, %v980_v40  ;;  %v2970_v52 = vunpack.i.l.bf16 %v3795_v15  ;;  %v2971_v20 = vunpack.i.h.bf16 %v3795_v15  ;;  %v834_v15 = vsel %vm830_vm1, %v2861_v22, %v2966_v54 }
 0x202   :  { %1091 = vmatprep.mubr.f32.mxu1 %v979_v18  ;;  %v2980_v7 = vunpack.i.l.bf16 %v3789_v45 }
 0x203   :  { %2674 = vmatprep.subr.bf16.mxu1 %v2673_v17  ;;  %v1243_v17 = vld [vmem:[%s4834_s4] sm:$0xff]  ;;  %v870_v6 = vsel %vm867_vm2, %v833_v14, %v2970_v52  ;;  %v2981_v52 = vunpack.i.h.bf16 %v3789_v45 }
 0x204   :  { %v3797_v4 = vpop.permute.xlu0 %2998  ;;  %2676 = vmatpush3.bf16.msra.mxu1 %v2675_v43  ;;  %v3804_v5 = vpop.permute.xlu1 %2973 }
 0x205   :  { %3128 = vrot.lane.b32.xlu1 %v3755_v59, %s3414_s16  ;;  %v2975_v57 = vunpack.i.l.bf16 %v3804_v5  ;;  %v2976_v61 = vunpack.i.h.bf16 %v3804_v5  ;;  %v871_v5 = vsel %vm867_vm2, %v834_v15, %v2971_v20  ;;  %v3001_v53 = vunpack.i.h.bf16 %v3797_v4 }
 0x206   :  { %v3000_v54 = vunpack.i.l.bf16 %v3797_v4 }
 0x207   :  { %v907_v49 = vsel %vm904_vm3, %v870_v6, %v2975_v57  ;;  %v908_v22 = vsel %vm904_vm3, %v871_v5, %v2976_v61  ;;  %v4850_v6 = vunpack.i.h.bf16 %v3644_v24 }
 0x208   :  { %v3806_v10 = vpop.permute.xlu0 %3003  ;;  %v3814_v12 = vpop.permute.xlu1 %2983  ;;  %v4007_v15 = vsel %vm941_vm4, %v907_v49, %v2980_v7  ;;  %v4015_v4 = vsel %vm941_vm4, %v908_v22, %v2981_v52  ;;  %v4851_v22 = vunpack.i.l.bf16 %v3628_v16 }
 0x209   :  { %3138 = vrot.lane.b32.xlu1 %v3761_v1, %s3418_s20  ;;  %v2985_v27 = vunpack.i.l.bf16 %v3814_v12  ;;  %v2986_v23 = vunpack.i.h.bf16 %v3814_v12  ;;  %v3005_v57 = vunpack.i.l.bf16 %v3806_v10 }
 0x20b   :  { %v835_v45 = vsel %vm830_vm1, %v2865_v28, %v2985_v27  ;;  %v843_v24 = vsel %vm830_vm1, %v4851_v22, %v3005_v57  ;;  %v4854_v22 = vunpack.i.l.bf16 %v3704_v46 }
 0x20c   :  { %v3810_v11 = vpop.permute.xlu0 %3008  ;;  %v3820_v43 = vpop.permute.xlu1 %2988 }
 0x20d   :  { %v2990_v21 = vunpack.i.l.bf16 %v3820_v43  ;;  %v2991_v20 = vunpack.i.h.bf16 %v3820_v43  ;;  %v3006_v43 = vunpack.i.h.bf16 %v3806_v10  ;;  %v3010_v61 = vunpack.i.l.bf16 %v3810_v11 }
 0x20f   :  { %v872_v5 = vsel %vm867_vm2, %v835_v45, %v2990_v21  ;;  %v4852_v45 = vunpack.i.h.bf16 %v3628_v16 }
 0x210   :  { %v3816_v13 = vpop.permute.xlu0 %3013  ;;  %v3832_v31 = vpop.permute.xlu1 %2993 }
 0x211   :  { %3143 = vrot.lane.b32.xlu0 %v3816_v13, %s3415_s17  ;;  %v2995_v9 = vunpack.i.l.bf16 %v3832_v31  ;;  %v2996_v48 = vunpack.i.h.bf16 %v3832_v31  ;;  %v836_v31 = vsel %vm830_vm1, %v4850_v6, %v2986_v23  ;;  %v4043_v6 = vsel %vm867_vm2, %v843_v24, %v3010_v61 }
 0x212   :  { %v873_v50 = vsel %vm867_vm2, %v836_v31, %v2991_v20  ;;  %v4853_v31 = vunpack.i.h.bf16 %v3704_v46 }
 0x213   :  { %v909_v27 = vsel %vm904_vm3, %v872_v5, %v2995_v9  ;;  %v910_v20 = vsel %vm904_vm3, %v873_v50, %v2996_v48 }
 0x214   :  { %v3822_v25 = vpop.permute.xlu0 %3018  ;;  %v3838_v32 = vpop.permute.xlu1 %3023  ;;  %v4054_v48 = vsel %vm941_vm4, %v909_v27, %v3000_v54 }
 0x215   :  { %3163 = vrot.lane.b32.xlu1 %v3822_v25, %s3415_s17  ;;  %3148 = vrot.lane.b32.xlu0 %v3816_v13, %s3418_s20 }
 0x218   :  { %v3864_v39 = vpop.permute.xlu0 %3028  ;;  %v3890_v0 = vpop.permute.xlu1 %3033 }
 0x219   :  { %3168 = vrot.lane.b32.xlu1 %v3761_v1, %s3409_s1  ;;  %3153 = vrot.lane.b32.xlu0 %v3816_v13, %s3409_s1  ;;  %4849 = vst [vmem:[#allocation2_spill] sm:$0xff] %v3864_v39  ;;  %v3036_v49 = vunpack.i.h.bf16 %v3890_v0  ;;  %v3035_v7 = vunpack.i.l.bf16 %v3890_v0 }
 0x21b   :  { %v854_v5 = vsel %vm830_vm1, %v4853_v31, %v3036_v49  ;;  %v853_v50 = vsel %vm830_vm1, %v4854_v22, %v3035_v7  ;;  %v4855_v49 = vunpack.i.h.bf16 %v3698_v44 }
 0x21c   :  { %v3896_v18 = vpop.permute.xlu1 %3038 }
 0x21d   :  { %3193 = vrot.lane.b32.xlu1 %v3761_v1, %s3414_s16  ;;  %3158 = vrot.lane.b32.xlu0 %v3816_v13, %s3414_s16  ;;  %v3041_v28 = vunpack.i.h.bf16 %v3896_v18  ;;  %v3040_v10 = vunpack.i.l.bf16 %v3896_v18  ;;  %v4039_v18 = vsel %vm830_vm1, %v4852_v45, %v3006_v43 }
 0x21f   :  { %v890_v43 = vsel %vm867_vm2, %v853_v50, %v3040_v10  ;;  %v891_v61 = vsel %vm867_vm2, %v854_v5, %v3041_v28  ;;  %v4856_v10 = vunpack.i.l.bf16 %v3698_v44 }
 0x220   :  { %v3903_v36 = vpop.permute.xlu1 %3043 }
 0x221   :  { %3198 = vrot.lane.b32.xlu1 %v3628_v16, %s3414_s16  ;;  %3173 = vrot.lane.b32.xlu0 %v3822_v25, %s3418_s20  ;;  %v3046_v24 = vunpack.i.h.bf16 %v3903_v36 }
 0x224   :  { %v3915_v34 = vpop.permute.xlu1 %3048 }
 0x225   :  { %3223 = vrot.lane.b32.xlu1 %v3838_v32, %s3418_s20  ;;  %3178 = vrot.lane.b32.xlu0 %v3822_v25, %s3409_s1  ;;  %v3050_v7 = vunpack.i.l.bf16 %v3915_v34 }
 0x228   :  { %v3919_v38 = vpop.permute.xlu1 %3068 }
 0x229   :  { %3228 = vrot.lane.b32.xlu1 %v3838_v32, %s3409_s1  ;;  %3183 = vrot.lane.b32.xlu0 %v3822_v25, %s3414_s16 }
 0x22c   :  { %v3923_v3 = vpop.permute.xlu1 %3088 }
 0x22d   :  { %3233 = vrot.lane.b32.xlu1 %v3838_v32, %s3414_s16  ;;  %3188 = vrot.lane.b32.xlu0 %v3628_v16, %s3409_s1  ;;  %v3045_v16 = vunpack.i.l.bf16 %v3903_v36 }
 0x231   :  { %3243 = vrot.lane.b32.xlu1 %v3747_v55, %s3415_s17  ;;  %3203 = vrot.lane.b32.xlu0 %v3654_v26, %s3415_s17 }
 0x235   :  { %3253 = vrot.lane.b32.xlu1 %v3747_v55, %s3409_s1  ;;  %3208 = vrot.lane.b32.xlu0 %v3654_v26, %s3418_s20 }
 0x239   :  { %3263 = vrot.lane.b32.xlu1 %v3864_v39, %s3415_s17  ;;  %3213 = vrot.lane.b32.xlu0 %v3654_v26, %s3409_s1 }
 0x23d   :  { %3273 = vrot.lane.b32.xlu1 %v3864_v39, %s3409_s1  ;;  %3218 = vrot.lane.b32.xlu0 %v3838_v32, %s3415_s17 }
 0x241   :  { %1247 = vperm.xlu1 %2836, %v1243_v17   ;;  %3238 = vrot.lane.b32.xlu0 %v3654_v26, %s3414_s16  ;;  %v3908_v17 = vpop.permute.xlu0 %3053 }
 0x242   :  { %v3056_v23 = vunpack.i.h.bf16 %v3908_v17  ;;  %v3055_v57 = vunpack.i.l.bf16 %v3908_v17  ;;  %v4060_v17 = vsel %vm941_vm4, %v910_v20, %v3001_v53  ;;  %v927_v20 = vsel %vm904_vm3, %v890_v43, %v3045_v16 }
 0x243   :  { %v4858_v16 = vunpack.i.l.bf16 %v3816_v13 }
 0x244   :  { %v840_v46 = vsel %vm830_vm1, %v4855_v49, %v3056_v23  ;;  %v839_v28 = vsel %vm830_vm1, %v4856_v10, %v3055_v57  ;;  %v928_v49 = vsel %vm904_vm3, %v891_v61, %v3046_v24  ;;  %v3070_v57 = vunpack.i.l.bf16 %v3919_v38 }
 0x245   :  { %3248 = vrot.lane.b32.xlu0 %v3747_v55, %s3418_s20  ;;  %v3917_v33 = vpop.permute.xlu0 %3058  ;;  %v4857_v10 = vunpack.i.h.bf16 %v3816_v13 }
 0x246   :  { %v3061_v36 = vunpack.i.h.bf16 %v3917_v33  ;;  %v3060_v5 = vunpack.i.l.bf16 %v3917_v33 }
 0x249   :  { %3258 = vrot.lane.b32.xlu0 %v3747_v55, %s3414_s16  ;;  %v3921_v37 = vpop.permute.xlu0 %3063 }
 0x24a   :  { %v3066_v9 = vunpack.i.h.bf16 %v3921_v37  ;;  %v3065_v44 = vunpack.i.l.bf16 %v3921_v37 }
 0x24d   :  { %3268 = vrot.lane.b32.xlu0 %v3864_v39, %s3418_s20  ;;  %v3925_v40 = vpop.permute.xlu0 %3073 }
 0x251   :  { %3278 = vrot.lane.b32.xlu0 %v3864_v39, %s3414_s16  ;;  %v3931_v62 = vpop.permute.xlu0 %3078  ;;  %v3076_v39 = vunpack.i.h.bf16 %v3925_v40 }
 0x255   :  { %1252 = vperm.xlu0 %2835, %v1244_v35   ;;  %v3935_v29 = vpop.permute.xlu0 %3083 }
 0x263   :  { %v3927_v2 = vpop.permute.xlu1 %3098  ;;  %v3939_v60 = vpop.permute.xlu0 %3093 }
 0x267   :  { %v3929_v63 = vpop.permute.xlu1 %3103  ;;  %v3957_v19 = vpop.permute.xlu0 %3113 }
 0x26b   :  { %v3933_v30 = vpop.permute.xlu1 %3108  ;;  %v3986_v8 = vpop.permute.xlu0 %3133 }
 0x26f   :  { %v3937_v35 = vpop.permute.xlu1 %3118 }
 0x273   :  { %v3953_v47 = vpop.permute.xlu1 %3123 }
 0x277   :  { %v3971_v41 = vpop.permute.xlu1 %3128 }
 0x27b   :  { %v4004_v14 = vpop.permute.xlu1 %3138 }
 0x283   :  { %v3144_v12 = vpop.permute.xlu0 %3143 }
 0x284   :  { %v3146_v45 = vunpack.i.h.bf16 %v3144_v12  ;;  %v3145_v31 = vunpack.i.l.bf16 %v3144_v12  ;;  %v3051_v12 = vunpack.i.h.bf16 %v3915_v34 }
 0x286   :  { %v849_v33 = vsel %vm830_vm1, %v4858_v16, %v3145_v31  ;;  %v3095_v16 = vunpack.i.l.bf16 %v3939_v60 }
 0x287   :  { %v4031_v52 = vpop.permute.xlu1 %3163  ;;  %v3149_v21 = vpop.permute.xlu0 %3148 }
 0x288   :  { %v3151_v27 = vunpack.i.h.bf16 %v3149_v21  ;;  %v3150_v53 = vunpack.i.l.bf16 %v3149_v21  ;;  %v850_v21 = vsel %vm830_vm1, %v4857_v10, %v3146_v45  ;;  %v3075_v45 = vunpack.i.l.bf16 %v3925_v40 }
 0x289   :  { %v3071_v10 = vunpack.i.h.bf16 %v3919_v38  ;;  %v2683_v38 = vpack.c.bf16 %v4060_v17, %v4054_v48  ;;  %v3141_v48 = vunpack.i.h.bf16 %v4004_v14  ;;  %v3140_v17 = vunpack.i.l.bf16 %v4004_v14 }
 0x28a   :  { %v886_v34 = vsel %vm867_vm2, %v849_v33, %v3150_v53  ;;  %v887_v61 = vsel %vm867_vm2, %v850_v21, %v3151_v27  ;;  %v4100_v27 = vsel %vm941_vm4, %v928_v49, %v3051_v12  ;;  %v877_v21 = vsel %vm867_vm2, %v840_v46, %v3061_v36 }
 0x28b   :  { %v4066_v22 = vpop.permute.xlu1 %3168  ;;  %v3154_v54 = vpop.permute.xlu0 %3153  ;;  %v4859_v49 = vunpack.i.h.bf16 %v3723_v51  ;;  %v4869_v14 = vunpack.i.h.bf16 %v3810_v11 }
 0x28c   :  { %v3156_v23 = vunpack.i.h.bf16 %v3154_v54  ;;  %v3155_v50 = vunpack.i.l.bf16 %v3154_v54  ;;  %v4086_v54 = vsel %vm941_vm4, %v927_v20, %v3050_v7  ;;  %v876_v20 = vsel %vm867_vm2, %v839_v28, %v3060_v5 }
 0x28d   :  { %v842_v12 = vsel %vm830_vm1, %v4859_v49, %v3076_v39  ;;  %v4860_v28 = vunpack.i.l.bf16 %v3723_v51  ;;  %v2685_v36 = vpack.c.bf16 %v4100_v27, %v4086_v54  ;;  %v4861_v51 = vpack.c.bf16 %v4015_v4, %v4007_v15 }
 0x28e   :  { %v923_v13 = vsel %vm904_vm3, %v886_v34, %v3155_v50  ;;  %v924_v31 = vsel %vm904_vm3, %v887_v61, %v3156_v23  ;;  %v3080_v50 = vunpack.i.l.bf16 %v3931_v62  ;;  %v914_v23 = vsel %vm904_vm3, %v877_v21, %v3066_v9 }
 0x28f   :  { %v3159_v43 = vpop.permute.xlu0 %3158  ;;  %v4090_v24 = vpop.permute.xlu1 %3193  ;;  %v841_v46 = vsel %vm830_vm1, %v4860_v28, %v3075_v45  ;;  %v3096_v9 = vunpack.i.h.bf16 %v3939_v60  ;;  %v4130_v39 = vsel %vm941_vm4, %v914_v23, %v3071_v10  ;;  %v3081_v61 = vunpack.i.h.bf16 %v3931_v62 }
 0x290   :  { %v3161_v37 = vunpack.i.h.bf16 %v3159_v43  ;;  %v3160_v0 = vunpack.i.l.bf16 %v3159_v43  ;;  %v3090_v43 = vunpack.i.l.bf16 %v3923_v3  ;;  %v3166_v45 = vunpack.i.h.bf16 %v4031_v52 }
 0x291   :  { %v3085_v10 = vunpack.i.l.bf16 %v3935_v29  ;;  %v4863_v21 = vunpack.i.h.bf16 %v3753_v58  ;;  %v4865_v23 = vunpack.i.l.bf16 %v3822_v25  ;;  %v3196_v54 = vunpack.i.h.bf16 %v4090_v24 }
 0x292   :  { %v960_v7 = vsel %vm941_vm4, %v923_v13, %v3160_v0  ;;  %v961_v53 = vsel %vm941_vm4, %v924_v31, %v3161_v37  ;;  %v913_v0 = vsel %vm904_vm3, %v876_v20, %v3065_v44  ;;  %v3100_v44 = vunpack.i.l.bf16 %v3927_v2 }
 0x293   :  { %v3174_v40 = vpop.permute.xlu0 %3173  ;;  %v2677_v33 = vpack.c.bf16 %v961_v53, %v960_v7  ;;  %v4119_v5 = vsel %vm941_vm4, %v913_v0, %v3070_v57  ;;  %v4124_v34 = vpop.permute.xlu1 %3198  ;;  %v4862_v57 = vunpack.i.l.bf16 %v3753_v58  ;;  %v3165_v13 = vunpack.i.l.bf16 %v4031_v52 }
 0x294   :  { %v878_v31 = vsel %vm867_vm2, %v841_v46, %v3080_v50  ;;  %v3086_v7 = vunpack.i.h.bf16 %v3935_v29  ;;  %v3176_v15 = vunpack.i.h.bf16 %v3174_v40  ;;  %v3175_v4 = vunpack.i.l.bf16 %v3174_v40 }
 0x295   :  { %2678 = vmatprep.subr.bf16.mxu1 %v2677_v33  ;;  %v855_v37 = vsel %vm830_vm1, %v4862_v57, %v3095_v16  ;;  %v3101_v53 = vunpack.i.h.bf16 %v3927_v2  ;;  %v856_v16 = vsel %vm830_vm1, %v4863_v21, %v3096_v9  ;;  %v3106_v33 = vunpack.i.h.bf16 %v3929_v63 }
 0x296   :  { %2680 = vmatpush3.bf16.msra.mxu1 %v4861_v51  ;;  %v3105_v52 = vunpack.i.l.bf16 %v3929_v63  ;;  %v892_v50 = vsel %vm867_vm2, %v855_v37, %v3100_v44  ;;  %v3111_v0 = vunpack.i.h.bf16 %v3933_v30  ;;  %v3110_v40 = vunpack.i.l.bf16 %v3933_v30 }
 0x297   :  { %v3179_v60 = vpop.permute.xlu0 %3178  ;;  %v4864_v29 = vunpack.i.h.bf16 %v3822_v25  ;;  %v851_v58 = vsel %vm830_vm1, %v4865_v23, %v3165_v13  ;;  %v4158_v63 = vpop.permute.xlu1 %3223  ;;  %v893_v51 = vsel %vm867_vm2, %v856_v16, %v3101_v53  ;;  %v3116_v30 = vunpack.i.h.bf16 %v3957_v19 }
 0x298   :  { %v3181_v62 = vunpack.i.h.bf16 %v3179_v60  ;;  %v3180_v20 = vunpack.i.l.bf16 %v3179_v60  ;;  %v888_v46 = vsel %vm867_vm2, %v851_v58, %v3175_v4  ;;  %v929_v25 = vsel %vm904_vm3, %v892_v50, %v3105_v52 }
 0x299   :  { %v852_v2 = vsel %vm830_vm1, %v4864_v29, %v3166_v45  ;;  %v3115_v45 = vunpack.i.l.bf16 %v3957_v19  ;;  %v3121_v4 = vunpack.i.h.bf16 %v3937_v35  ;;  %v3120_v53 = vunpack.i.l.bf16 %v3937_v35 }
 0x29a   :  { %v889_v28 = vsel %vm867_vm2, %v852_v2, %v3176_v15  ;;  %v925_v57 = vsel %vm904_vm3, %v888_v46, %v3180_v20  ;;  %v930_v15 = vsel %vm904_vm3, %v893_v51, %v3106_v33  ;;  %v3126_v20 = vunpack.i.h.bf16 %v3953_v47 }
 0x29b   :  { %v3184_v49 = vpop.permute.xlu0 %3183  ;;  %v926_v37 = vsel %vm904_vm3, %v889_v28, %v3181_v62  ;;  %v3125_v62 = vunpack.i.l.bf16 %v3953_v47  ;;  %v966_v52 = vsel %vm941_vm4, %v929_v25, %v3110_v40  ;;  %v967_v19 = vsel %vm941_vm4, %v930_v15, %v3111_v0 }
 0x29c   :  { %v3186_v44 = vunpack.i.h.bf16 %v3184_v49  ;;  %v3185_v9 = vunpack.i.l.bf16 %v3184_v49  ;;  %v879_v50 = vsel %vm867_vm2, %v842_v12, %v3081_v61  ;;  %v915_v29 = vsel %vm904_vm3, %v878_v31, %v3085_v10  ;;  %v4187_v12 = vpop.permute.xlu1 %3228 }
 0x29d   :  { %v3131_v33 = vunpack.i.h.bf16 %v3971_v41  ;;  %v3130_v2 = vunpack.i.l.bf16 %v3971_v41  ;;  %v916_v35 = vsel %vm904_vm3, %v879_v50, %v3086_v7  ;;  %v4866_v23 = vunpack.i.h.bf16 %v3755_v59 }
 0x29e   :  { %v962_v13 = vsel %vm941_vm4, %v925_v57, %v3185_v9  ;;  %v963_v60 = vsel %vm941_vm4, %v926_v37, %v3186_v44  ;;  %v4867_v47 = vunpack.i.l.bf16 %v3755_v59  ;;  %v3136_v0 = vunpack.i.h.bf16 %v3986_v8 }
 0x29f   :  { %v3189_v21 = vpop.permute.xlu0 %3188  ;;  %v2681_v16 = vpack.c.bf16 %v963_v60, %v962_v13  ;;  %v858_v58 = vsel %vm830_vm1, %v4866_v23, %v3116_v30  ;;  %v3135_v41 = vunpack.i.l.bf16 %v3986_v8  ;;  %v2689_v59 = vpack.c.bf16 %v967_v19, %v966_v52 }
 0x2a0   :  { %v857_v40 = vsel %vm830_vm1, %v4867_v47, %v3115_v45  ;;  %v895_v31 = vsel %vm867_vm2, %v858_v58, %v3121_v4  ;;  %v3171_v8 = vunpack.i.h.bf16 %v4066_v22  ;;  %v3195_v27 = vunpack.i.l.bf16 %v4090_v24  ;;  %v3234_v11 = vpop.permute.xlu1 %3233 }
 0x2a1   :  { %2682 = vmatprep.subr.bf16.mxu1 %v2681_v16  ;;  %v894_v61 = vsel %vm867_vm2, %v857_v40, %v3120_v53  ;;  %v932_v49 = vsel %vm904_vm3, %v895_v31, %v3126_v20  ;;  %v3190_v44 = vunpack.i.l.bf16 %v3189_v21  ;;  %v4868_v9 = vpack.c.bf16 %v3977_v42, %v3974_v56 }
 0x2a2   :  { %2684 = vmatpush3.bf16.msra.mxu1 %v2683_v38  ;;  %v931_v10 = vsel %vm904_vm3, %v894_v61, %v3125_v62  ;;  %v3170_v38 = vunpack.i.l.bf16 %v4066_v22  ;;  %v969_v46 = vsel %vm941_vm4, %v932_v49, %v3131_v33  ;;  %v881_v51 = vsel %vm867_vm2, %v4039_v18, %v4869_v14 }
 0x2a3   :  { %v4195_v7 = vpop.permute.xlu0 %3203  ;;  %2686 = vmatprep.subr.bf16.mxu1 %v2685_v36  ;;  %v968_v28 = vsel %vm941_vm4, %v931_v10, %v3130_v2  ;;  %v3191_v36 = vunpack.i.h.bf16 %v3189_v21  ;;  %v3091_v22 = vunpack.i.h.bf16 %v3923_v3  ;;  %v4870_v30 = vunpack.i.h.bf16 %v3761_v1 }
 0x2a4   :  { %v4871_v37 = vunpack.i.l.bf16 %v3761_v1  ;;  %v2691_v18 = vpack.c.bf16 %v4130_v39, %v4119_v5  ;;  %v952_v45 = vsel %vm941_vm4, %v915_v29, %v3090_v43  ;;  %v2693_v60 = vpack.c.bf16 %v969_v46, %v968_v28  ;;  %v3244_v29 = vpop.permute.xlu1 %3243 }
 0x2a5   :  { %v860_v57 = vsel %vm830_vm1, %v4870_v30, %v3136_v0  ;;  %v953_v15 = vsel %vm941_vm4, %v916_v35, %v3091_v22  ;;  %v918_v4 = vsel %vm904_vm3, %v881_v51, %v3191_v36  ;;  %v917_v53 = vsel %vm904_vm3, %v4043_v6, %v3190_v44 }
 0x2a6   :  { %2688 = vmatpush3.bf16.msra.mxu1 %v4868_v9  ;;  %v859_v24 = vsel %vm830_vm1, %v4871_v37, %v3135_v41  ;;  %v897_v42 = vsel %vm867_vm2, %v860_v57, %v3141_v48  ;;  %v3201_v3 = vunpack.i.h.bf16 %v4124_v34  ;;  %v3200_v43 = vunpack.i.l.bf16 %v4124_v34 }
 0x2a7   :  { %v3209_v25 = vpop.permute.xlu0 %3208  ;;  %2690 = vmatprep.subr.bf16.mxu1 %v2689_v59  ;;  %v896_v56 = vsel %vm867_vm2, %v859_v24, %v3140_v17  ;;  %v934_v13 = vsel %vm904_vm3, %v897_v42, %v3171_v8  ;;  %v2695_v16 = vpack.c.bf16 %v953_v15, %v952_v45  ;;  %v3226_v20 = vunpack.i.h.bf16 %v4158_v63 }
 0x2a8   :  { %v933_v1 = vsel %vm904_vm3, %v896_v56, %v3170_v38  ;;  %v971_v5 = vsel %vm941_vm4, %v934_v13, %v3196_v54  ;;  %v954_v52 = vsel %vm941_vm4, %v917_v53, %v3200_v43  ;;  %v955_v19 = vsel %vm941_vm4, %v918_v4, %v3201_v3  ;;  %v3254_v44 = vpop.permute.xlu1 %3253  ;;  %v978_v4 = vld [vmem:[%s4833_s3] sm:$0xff] }
 0x2a9   :  { %v970_v21 = vsel %vm941_vm4, %v933_v1, %v3195_v27  ;;  %v3225_v6 = vunpack.i.l.bf16 %v4158_v63  ;;  %v3231_v50 = vunpack.i.h.bf16 %v4187_v12  ;;  %v3206_v33 = vunpack.i.h.bf16 %v4195_v7  ;;  %v982_v3 = vld [vmem:[%s4833_s3 + $0x20] sm:$0xff] }
 0x2aa   :  { %2692 = vmatpush3.bf16.msra.mxu1 %v2691_v18  ;;  %v2697_v62 = vpack.c.bf16 %v971_v5, %v970_v21  ;;  %v3205_v2 = vunpack.i.l.bf16 %v4195_v7  ;;  %v3230_v34 = vunpack.i.l.bf16 %v4187_v12  ;;  %v3236_v35 = vunpack.i.h.bf16 %v3234_v11 }
 0x2ab   :  { %v3214_v39 = vpop.permute.xlu0 %3213  ;;  %2694 = vmatprep.subr.bf16.mxu1 %v2693_v60  ;;  %v3211_v23 = vunpack.i.h.bf16 %v3209_v25  ;;  %v3210_v58 = vunpack.i.l.bf16 %v3209_v25  ;;  %v3235_v40 = vunpack.i.l.bf16 %v3234_v11  ;;  %v2699_v61 = vpack.c.bf16 %v955_v19, %v954_v52  ;;  %v981_v19 = vld [vmem:[%s4833_s3 + $0x18] sm:$0xff] }
 0x2ac   :  { %v3246_v63 = vunpack.i.h.bf16 %v3244_v29  ;;  %v3245_v31 = vunpack.i.l.bf16 %v3244_v29  ;;  %v3216_v59 = vunpack.i.h.bf16 %v3214_v39  ;;  %v3215_v10 = vunpack.i.l.bf16 %v3214_v39  ;;  %v3264_v53 = vpop.permute.xlu1 %3263 }
 0x2ad   :  { %v4872_v49 = vunpack.i.h.bf16 %v3654_v26  ;;  %v4873_v48 = vunpack.i.l.bf16 %v3654_v26  ;;  %v4874_v17 = vunpack.i.h.bf16 %v3838_v32  ;;  %v4875_v38 = vunpack.i.l.bf16 %v3838_v32 }
 0x2ae   :  { %2696 = vmatpush3.bf16.msra.mxu1 %v2695_v16  ;;  %v4876_v13 = vunpack.i.h.bf16 %v3747_v55  ;;  %v4877_v60 = vunpack.i.l.bf16 %v3747_v55  ;;  %v3256_v43 = vunpack.i.h.bf16 %v3254_v44  ;;  %v3255_v39 = vunpack.i.l.bf16 %v3254_v44  ;;  %v990_v44 = vld [vmem:[%s4833_s3 + $0x60] sm:$0xff] }
 0x2af   :  { %v3219_v47 = vpop.permute.xlu0 %3218  ;;  %2698 = vmatprep.subr.bf16.mxu1 %v2697_v62  ;;  %v846_v7 = vsel %vm830_vm1, %v4872_v49, %v3206_v33  ;;  %v845_v12 = vsel %vm830_vm1, %v4873_v48, %v3205_v2  ;;  %v3266_v62 = vunpack.i.h.bf16 %v3264_v53  ;;  %v3265_v52 = vunpack.i.l.bf16 %v3264_v53  ;;  %v985_v2 = vld [vmem:[%s4833_s3 + $0x38] sm:$0xff]  ;;  %v988_v49 = vld [vmem:[%s4833_s3 + $0x50] sm:$0xff] }
 0x2b0   :  { %v3221_v0 = vunpack.i.h.bf16 %v3219_v47  ;;  %v3220_v41 = vunpack.i.l.bf16 %v3219_v47  ;;  %v882_v46 = vsel %vm867_vm2, %v845_v12, %v3210_v58  ;;  %v883_v54 = vsel %vm867_vm2, %v846_v7, %v3211_v23  ;;  %v3274_v23 = vpop.permute.xlu1 %3273 }
 0x2b1   :  { %v919_v32 = vsel %vm904_vm3, %v882_v46, %v3215_v10  ;;  %v920_v30 = vsel %vm904_vm3, %v883_v54, %v3216_v59  ;;  %v864_v1 = vsel %vm830_vm1, %v4876_v13, %v3246_v63  ;;  %v863_v15 = vsel %vm830_vm1, %v4877_v60, %v3245_v31  ;;  %v984_v31 = vld [vmem:[%s4833_s3 + $0x30] sm:$0xff] }
 0x2b2   :  { %v862_v8 = vsel %vm830_vm1, %v4874_v17, %v3221_v0  ;;  %v861_v28 = vsel %vm830_vm1, %v4875_v38, %v3220_v41  ;;  %2700 = vmatpush3.bf16.msra.mxu1 %v2699_v61  ;;  %v3276_v7 = vunpack.i.h.bf16 %v3274_v23  ;;  %v3275_v48 = vunpack.i.l.bf16 %v3274_v23  ;;  %v987_v38 = vld [vmem:[%s4833_s3 + $0x48] sm:$0xff] }
 0x2b3   :  { %v899_v27 = vsel %vm867_vm2, %v862_v8, %v3226_v20  ;;  %v898_v36 = vsel %vm867_vm2, %v861_v28, %v3225_v6  ;;  %v3239_v26 = vpop.permute.xlu0 %3238 }
 0x2b4   :  { %v3241_v9 = vunpack.i.h.bf16 %v3239_v26  ;;  %v3240_v14 = vunpack.i.l.bf16 %v3239_v26  ;;  %v935_v51 = vsel %vm904_vm3, %v898_v36, %v3230_v34  ;;  %v936_v22 = vsel %vm904_vm3, %v899_v27, %v3231_v50  ;;  %v991_v36 = vld [vmem:[%s4833_s3 + $0x68] sm:$0xff] }
 0x2b5   :  { %v972_v57 = vsel %vm941_vm4, %v935_v51, %v3235_v40  ;;  %v973_v37 = vsel %vm941_vm4, %v936_v22, %v3236_v35  ;;  %v4878_v40 = vld [vmem:[#allocation2_spill] sm:$0xff]  ;;  %v993_v22 = vld [vmem:[%s4833_s3 + $0x78] sm:$0xff] }
 0x2b6   :  { %v2701_v24 = vpack.c.bf16 %v973_v37, %v972_v57  ;;  %v956_v25 = vsel %vm941_vm4, %v919_v32, %v3240_v14  ;;  %v957_v56 = vsel %vm941_vm4, %v920_v30, %v3241_v9  ;;  %v4879_v0 = vunpack.i.h.bf16 %v4878_v40  ;;  %v983_v9 = vld [vmem:[%s4833_s3 + $0x28] sm:$0xff]  ;;  %v994_v14 = vld [vmem:[%s4833_s3 + $0x80] sm:$0xff]  ;;  %v989_v32 = vld [vmem:[%s4833_s3 + $0x58] sm:$0xff] }
 0x2b7   :  { %v3249_v42 = vpop.permute.xlu0 %3248  ;;  %v2703_v11 = vpack.c.bf16 %v957_v56, %v956_v25  ;;  %v4880_v61 = vunpack.i.l.bf16 %v4878_v40  ;;  %v986_v51 = vld [vmem:[%s4833_s3 + $0x40] sm:$0xff]  ;;  %v997_v30 = vld [vmem:[%s4833_s3 + $0x98] sm:$0xff]  ;;  %v992_v57 = vld [vmem:[%s4833_s3 + $0x70] sm:$0xff] }
 0x2b8   :  { %v3251_v18 = vunpack.i.h.bf16 %v3249_v42  ;;  %v3250_v45 = vunpack.i.l.bf16 %v3249_v42  ;;  %2702 = vmatprep.subr.bf16.mxu1 %v2701_v24  ;;  %v866_v41 = vsel %vm830_vm1, %v4879_v0, %v3266_v62  ;;  %v996_v37 = vld [vmem:[%s4833_s3 + $0x90] sm:$0xff]  ;;  %v995_v24 = vld [vmem:[%s4833_s3 + $0x88] sm:$0xff]  ;;  %v998_v56 = vld [vmem:[%s4833_s3 + $0xa0] sm:$0xff] }
 0x2b9   :  { %2704 = vmatpush3.bf16.msra.mxu1 %v2703_v11  ;;  %v865_v63 = vsel %vm830_vm1, %v4880_v61, %v3265_v52  ;;  %v1000_v25 = vld [vmem:[%s4833_s3 + $0xb0] sm:$0xff]  ;;  %v999_v42 = vld [vmem:[%s4833_s3 + $0xa8] sm:$0xff]  ;;  %v1001_v11 = vld [vmem:[%s4833_s3 + $0xb8] sm:$0xff]  ;;  %s3420_s3 = smov 122  }
 0x2ba   :  { %v901_v21 = vsel %vm867_vm2, %v864_v1, %v3251_v18  ;;  %v900_v5 = vsel %vm867_vm2, %v863_v15, %v3250_v45 }
 0x2bb   :  { %v3259_v16 = vpop.permute.xlu0 %3258  ;;  %v937_v6 = vsel %vm904_vm3, %v900_v5, %v3255_v39  ;;  %v938_v50 = vsel %vm904_vm3, %v901_v21, %v3256_v43 }
 0x2bc   :  { %v3261_v55 = vunpack.i.h.bf16 %v3259_v16  ;;  %v3260_v20 = vunpack.i.l.bf16 %v3259_v16  ;;  %1092 = vmatmul.mubr.f32.vlgmr.msra.gmra.mrb[0].mxu1 %v978_v4 }
 0x2bd   :  { %1096 = vmatprep.mubr.f32.mxu1 %v982_v3 }
 0x2be   :  { %v974_v29 = vsel %vm941_vm4, %v937_v6, %v3260_v20  ;;  %v975_v33 = vsel %vm941_vm4, %v938_v50, %v3261_v55 }
 0x2bf   :  { %v3269_v34 = vpop.permute.xlu0 %3268  ;;  %v2705_v35 = vpack.c.bf16 %v975_v33, %v974_v29 }
 0x2c0   :  { %v3271_v58 = vunpack.i.h.bf16 %v3269_v34  ;;  %v3270_v47 = vunpack.i.l.bf16 %v3269_v34  ;;  %1097 = vmatmul.mubr.f32.gmra.mrb[2].mxu1 %v981_v19 }
 0x2c1   :  { %2706 = vmatprep.subr.bf16.mxu0 %v2705_v35  ;;  %1101 = vmatprep.mubr.f32.mxu1 %v985_v2 }
 0x2c2   :  { %v903_v59 = vsel %vm867_vm2, %v866_v41, %v3271_v58  ;;  %v902_v10 = vsel %vm867_vm2, %v865_v63, %v3270_v47  ;;  %2708 = vmatpush3.bf16.msra.mxu0 %v2705_v35 }
 0x2c3   :  { %v3279_v12 = vpop.permute.xlu0 %3278  ;;  %v939_v28 = vsel %vm904_vm3, %v902_v10, %v3275_v48  ;;  %v940_v46 = vsel %vm904_vm3, %v903_v59, %v3276_v7 }
 0x2c4   :  { %v3281_v17 = vunpack.i.h.bf16 %v3279_v12  ;;  %v3280_v8 = vunpack.i.l.bf16 %v3279_v12  ;;  %1102 = vmatmul.mubr.f32.gmra.mrb[4].mxu1 %v984_v31 }
 0x2c5   :  { %1106 = vmatprep.mubr.f32.mxu1 %v988_v49 }
 0x2c6   :  { %v976_v54 = vsel %vm941_vm4, %v939_v28, %v3280_v8  ;;  %v977_v27 = vsel %vm941_vm4, %v940_v46, %v3281_v17  ;;  %v1248_v46 = vpop.permute.xlu1 %1247 }
 0x2c7   :  { %v2709_v26 = vpack.c.bf16 %v977_v27, %v976_v54 }
 0x2c8   :  { %1107 = vmatmul.mubr.f32.gmra.mrb[6].mxu1 %v987_v38 }
 0x2c9   :  { %2710 = vmatprep.subr.bf16.mxu0 %v2709_v26  ;;  %1111 = vmatprep.mubr.f32.mxu1 %v991_v36 }
 0x2ca   :  { %2712 = vmatpush3.bf16.msra.mxu0 %v2709_v26 }
 0x2cc   :  { %1112 = vmatmul.mubr.f32.gmra.mrb[8].mxu1 %v990_v44 }
 0x2cd   :  { %2558 = vmatmul.mubr.msk.f32.vlgmr.msra.gmra.mrb[16].mxu0 %vm1002_vm5, %v983_v9  ;;  %1116 = vmatprep.mubr.f32.mxu1 %v994_v14 }
 0x2ce   :  { %2560 = vmatprep.mubr.msk.f32.mxu0 %vm1002_vm5, %v986_v51 }
 0x2d0   :  { %1117 = vmatmul.mubr.f32.gmra.mrb[10].mxu1 %v993_v22  ;;  %v3421_v22 = vmov 0.0|0.0  }
 0x2d1   :  { %2561 = vmatmul.mubr.msk.f32.gmra.mrb[18].mxu0 %vm1002_vm5, %v989_v32  ;;  %1121 = vmatprep.mubr.f32.mxu1 %v997_v30  ;;  %v1406_v32 = vld [vmem:[%s4835_s5 + $0x8] sm:$0xff] }
 0x2d2   :  { %2563 = vmatprep.mubr.msk.f32.mxu0 %vm1002_vm5, %v992_v57  ;;  %2745 = vmatprep.subr.bf16.mxu0 %v3421_v22 }
 0x2d4   :  { %1122 = vmatmul.mubr.f32.gmra.mrb[12].mxu1 %v996_v37  ;;  %v1253_v27 = vpop.permute.xlu0 %1252 }
 0x2d5   :  { %2564 = vmatmul.mubr.msk.f32.gmra.mrb[20].mxu0 %vm1002_vm5, %v995_v24  ;;  %1126 = vmatprep.mubr.f32.mxu1 %v1000_v25 }
 0x2d6   :  { %2566 = vmatprep.mubr.msk.f32.mxu0 %vm1002_vm5, %v998_v56 }
 0x2d8   :  { %1127 = vmatmul.mubr.f32.gmra.mrb[14].mxu1 %v999_v42 }
 0x2d9   :  { %2567 = vmatmul.mubr.msk.f32.gmra.mrb[22].mxu0 %vm1002_vm5, %v1001_v11  ;;  %1665 = vmatprep.mubr.f32.mxu1 %v1406_v32 }
 0x38f   :  { %v2357_v18 = vpop.f32.mrb[0].mxu1 }
 0x390   :  { %v2358_v45 = vpop.f32.mrb[1].mxu1 }
 0x391   :  { %v2359_v13 = vadd.f32 %v2358_v45, %v2357_v18 }
 0x393   :  { %v2360_v1 = vpop.f32.mrb[2].mxu1 }
 0x394   :  { %v2361_v60 = vpop.f32.mrb[3].mxu1 }
 0x395   :  { %v2362_v15 = vadd.f32 %v2361_v60, %v2360_v1 }
 0x397   :  { %v2363_v4 = vpop.f32.mrb[4].mxu1 }
 0x398   :  { %v2364_v53 = vpop.f32.mrb[5].mxu1 }
 0x399   :  { %v2365_v21 = vadd.f32 %v2364_v53, %v2363_v4 }
 0x39b   :  { %v2366_v5 = vpop.f32.mrb[6].mxu1 }
 0x39c   :  { %v2367_v3 = vpop.f32.mrb[7].mxu1 }
 0x39d   :  { %v2368_v43 = vadd.f32 %v2367_v3, %v2366_v5 }
 0x39f   :  { %v2369_v39 = vpop.f32.mrb[8].mxu1 }
 0x3a0   :  { %v2370_v16 = vpop.f32.mrb[9].mxu1  ;;  %v2559_v55 = vpop.f32.mrb[16].mxu0 }
 0x3a1   :  { %v2371_v20 = vadd.f32 %v2370_v16, %v2369_v39  ;;  %v1204_v62 = vadd.f32 %v2559_v55, %v2362_v15  ;;  %v1198_v52 = vpop.f32.mrb[17].mxu0 }
 0x3a2   :  { %v1199_v19 = vadd.f32 %v2359_v13, %v1198_v52 }
 0x3a3   :  { %v2372_v6 = vpop.f32.mrb[10].mxu1 }
 0x3a4   :  { %v2373_v50 = vpop.f32.mrb[11].mxu1  ;;  %v2562_v29 = vpop.f32.mrb[18].mxu0 }
 0x3a5   :  { %v2374_v33 = vadd.f32 %v2373_v50, %v2372_v6  ;;  %v1214_v2 = vadd.f32 %v2562_v29, %v2368_v43  ;;  %v1208_v34 = vpop.f32.mrb[19].mxu0  ;;  %v1466_v6 = vld [vmem:[%s4836_s6 + $0x8] sm:$0xff] }
 0x3a6   :  { %v1209_v35 = vadd.f32 %v2365_v21, %v1208_v34 }
 0x3a7   :  { %v1238_v23 = vmax.f32 %v1204_v62, %v1214_v2  ;;  %v2375_v58 = vpop.f32.mrb[12].mxu1 }
 0x3a8   :  { %v1237_v47 = vmax.f32 %v1199_v19, %v1209_v35  ;;  %v2376_v40 = vpop.f32.mrb[13].mxu1  ;;  %v2565_v0 = vpop.f32.mrb[20].mxu0 }
 0x3a9   :  { %v2377_v41 = vadd.f32 %v2376_v40, %v2375_v58  ;;  %v1224_v61 = vadd.f32 %v2565_v0, %v2374_v33  ;;  %v1218_v63 = vpop.f32.mrb[21].mxu0 }
 0x3aa   :  { %v1219_v31 = vadd.f32 %v2371_v20, %v1218_v63 }
 0x3ab   :  { %v2378_v59 = vpop.f32.mrb[14].mxu1 }
 0x3ac   :  { %v2379_v10 = vpop.f32.mrb[15].mxu1  ;;  %v2568_v49 = vpop.f32.mrb[22].mxu0 }
 0x3ad   :  { %v2380_v7 = vadd.f32 %v2379_v10, %v2378_v59  ;;  %v1228_v48 = vpop.f32.mrb[23].mxu0  ;;  %v1408_v10 = vld [vmem:[%s4835_s5 + $0x18] sm:$0xff] }
 0x3ae   :  { %v1229_v12 = vadd.f32 %v2377_v41, %v1228_v48  ;;  %2272 = vmatprep.mubr.msk.f32.mxu0 %vm1555_vm6, %v1408_v10  ;;  %v1901_v10 = vld [vmem:[%s4837_s8 + $0x48] sm:$0xff] }
 0x3af   :  { %v1234_v17 = vadd.f32 %v2568_v49, %v2380_v7  ;;  %v1470_v49 = vld [vmem:[%s4836_s6 + $0x28] sm:$0xff] }
 0x3b0   :  { %v1239_v8 = vmax.f32 %v1219_v31, %v1229_v12 }
 0x3b1   :  { %v1240_v38 = vmax.f32 %v1224_v61, %v1234_v17 }
 0x3b2   :  { %v1241_v28 = vmax.f32 %v1237_v47, %v1239_v8  ;;  %v1468_v47 = vld [vmem:[%s4836_s6 + $0x18] sm:$0xff] }
 0x3b3   :  { %v1242_v54 = vmax.f32 %v1238_v23, %v1240_v38  ;;  %v1472_v38 = vld [vmem:[%s4836_s6 + $0x38] sm:$0xff] }
 0x3b4   :  { %v1255_v36 = vadd.f32 %v1248_v46, %v1241_v28  ;;  %v1465_v46 = vld [vmem:[%s4836_s6] sm:$0xff] }
 0x3b5   :  { %v1256_v26 = vadd.f32 %v1253_v27, %v1242_v54 }
 0x3b6   :  { %v1257_v44 = vmax.f32 %v1255_v36, 0.0 }
 0x3b7   :  { %v1258_v9 = vmax.f32 %v1256_v26, 0.0 }
 0x3b9   :  { %v3287_v14 = vpack.i.bf16 %v1258_v9, %v1257_v44  ;;  %v2715_v51 = vpack.c.bf16 %v1258_v9, %v1257_v44  ;;  %v1474_v44 = vld [vmem:[%s4836_s6 + $0x48] sm:$0xff] }
 0x3bb   :  { %3288 = vrot.lane.b32.xlu0 %v3287_v14, %s3415_s17  ;;  %3283 = vrot.lane.b32.xlu1 %v3287_v14, %s3413_s15  ;;  %s3422_s17 = smov 96   ;;  %s3423_s15 = smov 108  }
 0x3bf   :  { %3298 = vrot.lane.b32.xlu0 %v3287_v14, %s3418_s20  ;;  %3293 = vrot.lane.b32.xlu1 %v3287_v14, %s3420_s3  ;;  %s3424_s20 = smov 106  }
 0x3c3   :  { %3308 = vrot.lane.b32.xlu0 %v3287_v14, %s3409_s1  ;;  %3303 = vrot.lane.b32.xlu1 %v3287_v14, %s3410_s12  ;;  %s3427_s12 = smov 100  }
 0x3c7   :  { %3318 = vrot.lane.b32.xlu0 %v3287_v14, %s3414_s16  ;;  %3313 = vrot.lane.b32.xlu1 %v3287_v14, %s3412_s14 }
 0x3cb   :  { %3328 = vrot.lane.b32.xlu0 %v3287_v14, %s3411_s13  ;;  %3323 = vrot.lane.b32.xlu1 %v3287_v14, %s3422_s17 }
 0x3cf   :  { %3333 = vrot.lane.b32.xlu0 %v3287_v14, %s3423_s15 }
 0x3d3   :  { %3338 = vrot.lane.b32.xlu0 %v3287_v14, %s3424_s20 }
 0x3d7   :  { %3343 = vrot.lane.b32.xlu0 %v3287_v14, %s3425_s29 }
 0x3db   :  { %3348 = vrot.lane.b32.xlu0 %v3287_v14, %s3426_s30 }
 0x3df   :  { %3353 = vrot.lane.b32.xlu0 %v3287_v14, %s3427_s12 }
 0x3e3   :  { %3358 = vrot.lane.b32.xlu0 %v3287_v14, %s3419_s21  ;;  %v1467_v14 = vld [vmem:[%s4836_s6 + $0x10] sm:$0xff] }
 0x42d   :  { %v3289_v30 = vpop.permute.xlu0 %3288  ;;  %v3284_v57 = vpop.permute.xlu1 %3283 }
 0x42e   :  { %v3286_v37 = vunpack.i.h.bf16 %v3284_v57  ;;  %v3285_v24 = vunpack.i.l.bf16 %v3284_v57  ;;  %v3291_v25 = vunpack.i.h.bf16 %v3289_v30  ;;  %v3290_v56 = vunpack.i.l.bf16 %v3289_v30  ;;  %3363 = vrot.lane.b32.xlu1 %v3284_v57, %s3422_s17 }
 0x430   :  { %v2719_v35 = vpack.c.bf16 %v3286_v37, %v3285_v24  ;;  %v2723_v63 = vpack.c.bf16 %v3291_v25, %v3290_v56  ;;  %v1476_v37 = vld [vmem:[%s4836_s6 + $0x58] sm:$0xff]  ;;  %v1469_v25 = vld [vmem:[%s4836_s6 + $0x20] sm:$0xff] }
 0x431   :  { %v4384_v42 = vpop.permute.xlu0 %3298  ;;  %v3294_v11 = vpop.permute.xlu1 %3293 }
 0x432   :  { %v3296_v18 = vunpack.i.h.bf16 %v3294_v11  ;;  %v3295_v45 = vunpack.i.l.bf16 %v3294_v11  ;;  %3368 = vrot.lane.b32.xlu1 %v3289_v30, %s3422_s17  ;;  %v3301_v60 = vunpack.i.h.bf16 %v4384_v42  ;;  %v3300_v15 = vunpack.i.l.bf16 %v4384_v42 }
 0x434   :  { %v2727_v12 = vpack.c.bf16 %v3296_v18, %v3295_v45  ;;  %v2731_v27 = vpack.c.bf16 %v3301_v60, %v3300_v15  ;;  %v1478_v45 = vld [vmem:[%s4836_s6 + $0x68] sm:$0xff]  ;;  %v1471_v60 = vld [vmem:[%s4836_s6 + $0x30] sm:$0xff] }
 0x435   :  { %v4387_v13 = vpop.permute.xlu0 %3308  ;;  %v4389_v1 = vpop.permute.xlu1 %3303 }
 0x436   :  { %3373 = vrot.lane.b32.xlu1 %v3294_v11, %s3422_s17  ;;  %v3306_v43 = vunpack.i.h.bf16 %v4389_v1  ;;  %v3305_v39 = vunpack.i.l.bf16 %v4389_v1  ;;  %v3311_v33 = vunpack.i.h.bf16 %v4387_v13  ;;  %v3310_v2 = vunpack.i.l.bf16 %v4387_v13 }
 0x438   :  { %v2735_v32 = vpack.c.bf16 %v3306_v43, %v3305_v39  ;;  %v1409_v43 = vld [vmem:[%s4835_s5 + $0x20] sm:$0xff]  ;;  %v1414_v39 = vld [vmem:[%s4835_s5 + $0x48] sm:$0xff] }
 0x439   :  { %v3319_v4 = vpop.permute.xlu0 %3318  ;;  %v4394_v53 = vpop.permute.xlu1 %3313 }
 0x43a   :  { %v3321_v21 = vunpack.i.h.bf16 %v3319_v4  ;;  %v3320_v5 = vunpack.i.l.bf16 %v3319_v4  ;;  %3398 = vrot.lane.b32.xlu0 %v3319_v4, %s3422_s17  ;;  %3378 = vrot.lane.b32.xlu1 %v4384_v42, %s3422_s17  ;;  %v3316_v0 = vunpack.i.h.bf16 %v4394_v53  ;;  %v3315_v41 = vunpack.i.l.bf16 %v4394_v53  ;;  %v1473_v4 = vld [vmem:[%s4836_s6 + $0x40] sm:$0xff] }
 0x43b   :  { %v2739_v42 = vpack.c.bf16 %v3311_v33, %v3310_v2  ;;  %v1893_v33 = vld [vmem:[%s4837_s8 + $0x8] sm:$0xff]  ;;  %v1421_v2 = vld [vmem:[%s4835_s5 + $0x80] sm:$0xff] }
 0x43c   :  { %v2713_v3 = vpack.c.bf16 %v3321_v21, %v3320_v5  ;;  %v2743_v15 = vpack.c.bf16 %v3316_v0, %v3315_v41  ;;  %v1410_v21 = vld [vmem:[%s4835_s5 + $0x28] sm:$0xff]  ;;  %v1894_v5 = vld [vmem:[%s4837_s8 + $0x10] sm:$0xff]  ;;  %v1429_v41 = vld [vmem:[%s4835_s5 + $0xc0] sm:$0xff] }
 0x43d   :  { %v3329_v16 = vpop.permute.xlu0 %3328  ;;  %v3324_v55 = vpop.permute.xlu1 %3323  ;;  %v1897_v0 = vld [vmem:[%s4837_s8 + $0x28] sm:$0xff] }
 0x43e   :  { %v3331_v20 = vunpack.i.h.bf16 %v3329_v16  ;;  %v3330_v62 = vunpack.i.l.bf16 %v3329_v16  ;;  %v3326_v52 = vunpack.i.h.bf16 %v3324_v55  ;;  %v3325_v19 = vunpack.i.l.bf16 %v3324_v55  ;;  %2714 = vmatprep.subr.bf16.mxu1 %v2713_v3  ;;  %1487 = vperm.xlu0 %2835, %v1466_v6   ;;  %v1475_v3 = vld [vmem:[%s4836_s6 + $0x50] sm:$0xff]  ;;  %v1896_v16 = vld [vmem:[%s4837_s8 + $0x20] sm:$0xff] }
 0x43f   :  { %2716 = vmatpush3.bf16.msra.mxu1 %v2715_v51  ;;  %3383 = vrot.lane.b32.xlu1 %v4389_v1, %s3422_s17  ;;  %v1477_v55 = vld [vmem:[%s4836_s6 + $0x60] sm:$0xff] }
 0x440   :  { %v2717_v50 = vpack.c.bf16 %v3331_v20, %v3330_v62  ;;  %v2746_v29 = vpack.c.bf16 %v3326_v52, %v3325_v19  ;;  %v1413_v20 = vld [vmem:[%s4835_s5 + $0x40] sm:$0xff]  ;;  %v1418_v62 = vld [vmem:[%s4835_s5 + $0x68] sm:$0xff]  ;;  %v1898_v52 = vld [vmem:[%s4837_s8 + $0x30] sm:$0xff] }
 0x441   :  { %v3334_v34 = vpop.permute.xlu0 %3333  ;;  %v1479_v19 = vld [vmem:[%s4836_s6 + $0x70] sm:$0xff]  ;;  %v1417_v6 = vld [vmem:[%s4835_s5 + $0x60] sm:$0xff] }
 0x442   :  { %v3336_v23 = vunpack.i.h.bf16 %v3334_v34  ;;  %v3335_v58 = vunpack.i.l.bf16 %v3334_v34  ;;  %2747 = vmatpush1.bf16.msra.mxu0 %v2746_v29  ;;  %2718 = vmatprep.subr.bf16.mxu1 %v2717_v50  ;;  %v1422_v50 = vld [vmem:[%s4835_s5 + $0x88] sm:$0xff]  ;;  %v1900_v29 = vld [vmem:[%s4837_s8 + $0x40] sm:$0xff] }
 0x443   :  { %2720 = vmatpush3.bf16.msra.mxu1 %v2719_v35  ;;  %2748 = vmatprep.subr.bf16.mxu0 %v3421_v22  ;;  %v1426_v34 = vld [vmem:[%s4835_s5 + $0xa8] sm:$0xff]  ;;  %v1902_v35 = vld [vmem:[%s4837_s8 + $0x50] sm:$0xf] }
 0x444   :  { %v2721_v40 = vpack.c.bf16 %v3336_v23, %v3335_v58  ;;  %1497 = vperm.xlu0 %2835, %v1468_v47   ;;  %3388 = vrot.lane.b32.xlu1 %v4387_v13, %s3422_s17  ;;  %v1892_v13 = vld [vmem:[%s4837_s8] sm:$0xff]  ;;  %v1895_v23 = vld [vmem:[%s4837_s8 + $0x18] sm:$0xff]  ;;  %v1430_v47 = vld [vmem:[%s4835_s5 + $0xc8] sm:$0xff] }
 0x445   :  { %v3339_v61 = vpop.permute.xlu0 %3338  ;;  %v1425_v58 = vld [vmem:[%s4835_s5 + $0xa0] sm:$0xff] }
 0x446   :  { %v3341_v31 = vunpack.i.h.bf16 %v3339_v61  ;;  %v3340_v59 = vunpack.i.l.bf16 %v3339_v61  ;;  %2722 = vmatprep.subr.bf16.mxu1 %v2721_v40  ;;  %v2115_v40 = vld [vmem:[%s4838_s10 + $0x8] sm:$0x3] }
 0x447   :  { %2724 = vmatpush3.bf16.msra.mxu1 %v2723_v63  ;;  %v1434_v61 = vld [vmem:[%s4835_s5 + $0xe8] sm:$0xff]  ;;  %v1899_v63 = vld [vmem:[%s4837_s8 + $0x38] sm:$0xff] }
 0x448   :  { %v2725_v7 = vpack.c.bf16 %v3341_v31, %v3340_v59  ;;  %1507 = vperm.xlu0 %2835, %v1470_v49   ;;  %3393 = vrot.lane.b32.xlu1 %v4394_v53, %s3422_s17  ;;  %v1405_v53 = vld [vmem:[%s4835_s5] sm:$0xff]  ;;  %v1438_v59 = vld [vmem:[%s4835_s5 + $0x108] sm:$0xff] }
 0x449   :  { %v3344_v48 = vpop.permute.xlu0 %3343  ;;  %v1433_v31 = vld [vmem:[%s4835_s5 + $0xe0] sm:$0xff] }
 0x44a   :  { %v3346_v17 = vunpack.i.h.bf16 %v3344_v48  ;;  %v3345_v8 = vunpack.i.l.bf16 %v3344_v48  ;;  %2726 = vmatprep.subr.bf16.mxu1 %v2725_v7  ;;  %v1437_v49 = vld [vmem:[%s4835_s5 + $0x100] sm:$0xff]  ;;  %v1442_v7 = vld [vmem:[%s4835_s5 + $0x128] sm:$0xff] }
 0x44b   :  { %2728 = vmatpush3.bf16.msra.mxu1 %v2727_v12  ;;  %v2114_v48 = vld [vmem:[%s4838_s10] sm:$0xff] }
 0x44c   :  { %v2729_v28 = vpack.c.bf16 %v3346_v17, %v3345_v8  ;;  %1517 = vperm.xlu0 %2835, %v1472_v38   ;;  %1482 = vperm.xlu1 %2836, %v1465_v46   ;;  %v1441_v12 = vld [vmem:[%s4835_s5 + $0x120] sm:$0xff]  ;;  %v1446_v17 = vld [vmem:[%s4835_s5 + $0x148] sm:$0xff] }
 0x44d   :  { %v3349_v54 = vpop.permute.xlu0 %3348  ;;  %v1445_v8 = vld [vmem:[%s4835_s5 + $0x140] sm:$0xff]  ;;  %v1450_v38 = vld [vmem:[%s4835_s5 + $0x168] sm:$0xff] }
 0x44e   :  { %v3351_v36 = vunpack.i.h.bf16 %v3349_v54  ;;  %v3350_v26 = vunpack.i.l.bf16 %v3349_v54  ;;  %2730 = vmatprep.subr.bf16.mxu1 %v2729_v28  ;;  %v1449_v28 = vld [vmem:[%s4835_s5 + $0x160] sm:$0xff]  ;;  %v1454_v46 = vld [vmem:[%s4835_s5 + $0x188] sm:$0xff] }
 0x44f   :  { %2732 = vmatpush3.bf16.msra.mxu1 %v2731_v27  ;;  %v1453_v54 = vld [vmem:[%s4835_s5 + $0x180] sm:$0xff]  ;;  %v1458_v27 = vld [vmem:[%s4835_s5 + $0x1a8] sm:$0xff] }
 0x450   :  { %v2733_v9 = vpack.c.bf16 %v3351_v36, %v3350_v26  ;;  %1527 = vperm.xlu0 %2835, %v1474_v44   ;;  %1492 = vperm.xlu1 %2836, %v1467_v14   ;;  %v1457_v36 = vld [vmem:[%s4835_s5 + $0x1a0] sm:$0xff]  ;;  %v1462_v26 = vld [vmem:[%s4835_s5 + $0x1c8] sm:$0xff] }
 0x451   :  { %v3354_v51 = vpop.permute.xlu0 %3353  ;;  %v1461_v44 = vld [vmem:[%s4835_s5 + $0x1c0] sm:$0xff] }
 0x452   :  { %v3356_v30 = vunpack.i.h.bf16 %v3354_v51  ;;  %v3355_v57 = vunpack.i.l.bf16 %v3354_v51  ;;  %2734 = vmatprep.subr.bf16.mxu1 %v2733_v9 }
 0x453   :  { %2736 = vmatpush3.bf16.msra.mxu1 %v2735_v32 }
 0x454   :  { %v2737_v24 = vpack.c.bf16 %v3356_v30, %v3355_v57  ;;  %1537 = vperm.xlu0 %2835, %v1476_v37   ;;  %1502 = vperm.xlu1 %2836, %v1469_v25  }
 0x455   :  { %v3359_v56 = vpop.permute.xlu0 %3358 }
 0x456   :  { %v3361_v11 = vunpack.i.h.bf16 %v3359_v56  ;;  %v3360_v18 = vunpack.i.l.bf16 %v3359_v56  ;;  %2738 = vmatprep.subr.bf16.mxu1 %v2737_v24 }
 0x457   :  { %2740 = vmatpush3.bf16.msra.mxu1 %v2739_v42 }
 0x458   :  { %v2741_v1 = vpack.c.bf16 %v3361_v11, %v3360_v18  ;;  %1547 = vperm.xlu0 %2835, %v1478_v45   ;;  %1512 = vperm.xlu1 %2836, %v1471_v60  }
 0x45a   :  { %2742 = vmatprep.subr.bf16.mxu1 %v2741_v1 }
 0x45b   :  { %2744 = vmatpush3.bf16.msra.mxu1 %v2743_v15 }
 0x45c   :  { %2772 = vmatprep.subr.bf16.mxu1 %v3421_v22  ;;  %1905 = vperm.xlu0 %2835, %v1892_v13  }
 0x45d   :  { %1522 = vperm.xlu1 %2836, %v1473_v4  }
 0x45e   :  { %1666 = vmatmul.mubr.f32.vlgmr.msra.gmra.mrb[16].mxu1 %v1405_v53 }
 0x45f   :  { %1670 = vmatprep.mubr.f32.mxu1 %v1410_v21 }
 0x460   :  { %1915 = vperm.xlu0 %2835, %v1894_v5  }
 0x461   :  { %1532 = vperm.xlu1 %2836, %v1475_v3  }
 0x462   :  { %1671 = vmatmul.mubr.f32.gmra.mrb[18].mxu1 %v1409_v43 }
 0x463   :  { %1675 = vmatprep.mubr.f32.mxu1 %v1414_v39 }
 0x464   :  { %1925 = vperm.xlu0 %2835, %v1896_v16  }
 0x465   :  { %1542 = vperm.xlu1 %2836, %v1477_v55  }
 0x466   :  { %1676 = vmatmul.mubr.f32.gmra.mrb[20].mxu1 %v1413_v20 }
 0x467   :  { %1680 = vmatprep.mubr.f32.mxu1 %v1418_v62 }
 0x468   :  { %1935 = vperm.xlu0 %2835, %v1898_v52  }
 0x469   :  { %1552 = vperm.xlu1 %2836, %v1479_v19  }
 0x46a   :  { %1681 = vmatmul.mubr.f32.gmra.mrb[22].mxu1 %v1417_v6 }
 0x46b   :  { %1685 = vmatprep.mubr.f32.mxu1 %v1422_v50  ;;  %v1407_v50 = vld [vmem:[%s4835_s5 + $0x10] sm:$0xff] }
 0x46c   :  { %1945 = vperm.xlu0 %2835, %v1900_v29   ;;  %v1412_v29 = vld [vmem:[%s4835_s5 + $0x38] sm:$0xff] }
 0x46d   :  { %1910 = vperm.xlu1 %2836, %v1893_v33   ;;  %v1411_v33 = vld [vmem:[%s4835_s5 + $0x30] sm:$0xff] }
 0x46e   :  { %1686 = vmatmul.mubr.f32.gmra.mrb[24].mxu1 %v1421_v2  ;;  %v1416_v2 = vld [vmem:[%s4835_s5 + $0x58] sm:$0xff] }
 0x46f   :  { %1690 = vmatprep.mubr.f32.mxu1 %v1426_v34  ;;  %v1415_v34 = vld [vmem:[%s4835_s5 + $0x50] sm:$0xff] }
 0x470   :  { %1955 = vperm.xlu0 %2835, %v1902_v35   ;;  %v1420_v35 = vld [vmem:[%s4835_s5 + $0x78] sm:$0xff] }
 0x471   :  { %1920 = vperm.xlu1 %2836, %v1895_v23   ;;  %v1419_v23 = vld [vmem:[%s4835_s5 + $0x70] sm:$0xff] }
 0x472   :  { %1691 = vmatmul.mubr.f32.gmra.mrb[26].mxu1 %v1425_v58  ;;  %v1424_v58 = vld [vmem:[%s4835_s5 + $0x98] sm:$0xff] }
 0x473   :  { %1695 = vmatprep.mubr.f32.mxu1 %v1430_v47  ;;  %v1423_v47 = vld [vmem:[%s4835_s5 + $0x90] sm:$0xff] }
 0x474   :  { %2123 = vperm.xlu0 %2835, %v2115_v40   ;;  %v1428_v40 = vld [vmem:[%s4835_s5 + $0xb8] sm:$0xff] }
 0x475   :  { %1930 = vperm.xlu1 %2836, %v1897_v0   ;;  %v1427_v0 = vld [vmem:[%s4835_s5 + $0xb0] sm:$0xff] }
 0x476   :  { %1696 = vmatmul.mubr.f32.gmra.mrb[28].mxu1 %v1429_v41  ;;  %v1432_v41 = vld [vmem:[%s4835_s5 + $0xd8] sm:$0xff] }
 0x477   :  { %1700 = vmatprep.mubr.f32.mxu1 %v1434_v61  ;;  %v1431_v61 = vld [vmem:[%s4835_s5 + $0xd0] sm:$0xff] }
 0x479   :  { %1940 = vperm.xlu1 %2836, %v1899_v63   ;;  %v1436_v63 = vld [vmem:[%s4835_s5 + $0xf8] sm:$0xff] }
 0x47a   :  { %1701 = vmatmul.mubr.f32.gmra.mrb[30].mxu1 %v1433_v31  ;;  %v1435_v31 = vld [vmem:[%s4835_s5 + $0xf0] sm:$0xff] }
 0x47b   :  { %1705 = vmatprep.mubr.f32.mxu1 %v1438_v59  ;;  %v1440_v59 = vld [vmem:[%s4835_s5 + $0x118] sm:$0xff] }
 0x47d   :  { %1950 = vperm.xlu1 %2836, %v1901_v10   ;;  %v1439_v10 = vld [vmem:[%s4835_s5 + $0x110] sm:$0xff] }
 0x47e   :  { %1706 = vmatmul.mubr.f32.gmra.mrb[32].mxu1 %v1437_v49  ;;  %v1444_v49 = vld [vmem:[%s4835_s5 + $0x138] sm:$0xff] }
 0x47f   :  { %1710 = vmatprep.mubr.f32.mxu1 %v1442_v7  ;;  %v1443_v7 = vld [vmem:[%s4835_s5 + $0x130] sm:$0xff] }
 0x481   :  { %2118 = vperm.xlu1 %2836, %v2114_v48   ;;  %v1448_v48 = vld [vmem:[%s4835_s5 + $0x158] sm:$0xff] }
 0x482   :  { %1711 = vmatmul.mubr.f32.gmra.mrb[34].mxu1 %v1441_v12  ;;  %v1447_v12 = vld [vmem:[%s4835_s5 + $0x150] sm:$0xff] }
 0x483   :  { %1715 = vmatprep.mubr.f32.mxu1 %v1446_v17  ;;  %v1452_v17 = vld [vmem:[%s4835_s5 + $0x178] sm:$0xff] }
 0x486   :  { %1716 = vmatmul.mubr.f32.gmra.mrb[36].mxu1 %v1445_v8  ;;  %v1451_v8 = vld [vmem:[%s4835_s5 + $0x170] sm:$0xff] }
 0x487   :  { %1720 = vmatprep.mubr.f32.mxu1 %v1450_v38  ;;  %v1456_v38 = vld [vmem:[%s4835_s5 + $0x198] sm:$0xff] }
 0x48a   :  { %1721 = vmatmul.mubr.f32.gmra.mrb[38].mxu1 %v1449_v28  ;;  %v1455_v28 = vld [vmem:[%s4835_s5 + $0x190] sm:$0xff] }
 0x48b   :  { %1725 = vmatprep.mubr.f32.mxu1 %v1454_v46  ;;  %v1460_v46 = vld [vmem:[%s4835_s5 + $0x1b8] sm:$0xff] }
 0x48e   :  { %1726 = vmatmul.mubr.f32.gmra.mrb[40].mxu1 %v1453_v54  ;;  %v1459_v54 = vld [vmem:[%s4835_s5 + $0x1b0] sm:$0xff] }
 0x48f   :  { %1730 = vmatprep.mubr.f32.mxu1 %v1458_v27  ;;  %v1464_v27 = vld [vmem:[%s4835_s5 + $0x1d8] sm:$0xff] }
 0x492   :  { %1731 = vmatmul.mubr.f32.gmra.mrb[42].mxu1 %v1457_v36  ;;  %v1463_v36 = vld [vmem:[%s4835_s5 + $0x1d0] sm:$0xff] }
 0x493   :  { %1735 = vmatprep.mubr.f32.mxu1 %v1462_v26 }
 0x496   :  { %1736 = vmatmul.mubr.f32.gmra.mrb[44].mxu1 %v1461_v44 }
 0x4a0   :  { %v3364_v9 = vpop.permute.xlu1 %3363 }
 0x4a1   :  { %v3366_v14 = vunpack.i.h.bf16 %v3364_v9  ;;  %v3365_v51 = vunpack.i.l.bf16 %v3364_v9 }
 0x4a3   :  { %v2749_v32 = vpack.c.bf16 %v3366_v14, %v3365_v51 }
 0x4a4   :  { %v3369_v30 = vpop.permute.xlu1 %3368 }
 0x4a5   :  { %v3371_v57 = vunpack.i.h.bf16 %v3369_v30  ;;  %v3370_v37 = vunpack.i.l.bf16 %v3369_v30  ;;  %2750 = vmatpush1.bf16.msra.mxu0 %v2749_v32 }
 0x4a6   :  { %2751 = vmatprep.subr.bf16.mxu0 %v3421_v22 }
 0x4a7   :  { %v2752_v24 = vpack.c.bf16 %v3371_v57, %v3370_v37 }
 0x4a8   :  { %v3374_v25 = vpop.permute.xlu1 %3373 }
 0x4a9   :  { %v3376_v56 = vunpack.i.h.bf16 %v3374_v25  ;;  %v3375_v42 = vunpack.i.l.bf16 %v3374_v25  ;;  %2753 = vmatpush1.bf16.msra.mxu0 %v2752_v24 }
 0x4aa   :  { %2754 = vmatprep.subr.bf16.mxu0 %v3421_v22 }
 0x4ab   :  { %v2755_v11 = vpack.c.bf16 %v3376_v56, %v3375_v42 }
 0x4ac   :  { %v3379_v18 = vpop.permute.xlu1 %3378  ;;  %v3399_v39 = vpop.permute.xlu0 %3398 }
 0x4ad   :  { %2756 = vmatpush1.bf16.msra.mxu0 %v2755_v11  ;;  %v3381_v45 = vunpack.i.h.bf16 %v3379_v18  ;;  %v3380_v1 = vunpack.i.l.bf16 %v3379_v18  ;;  %v3401_v62 = vunpack.i.h.bf16 %v3399_v39  ;;  %v3400_v52 = vunpack.i.l.bf16 %v3399_v39 }
 0x4ae   :  { %2757 = vmatprep.subr.bf16.mxu0 %v3421_v22 }
 0x4af   :  { %v2758_v60 = vpack.c.bf16 %v3381_v45, %v3380_v1  ;;  %v2770_v6 = vpack.c.bf16 %v3401_v62, %v3400_v52  ;;  %v3429_v52 = vmov 0.0  }
 0x4b0   :  { %2599 = vmatprep.mubr.msk.f32.mxu1 %vm3428_vm7, %v3429_v52 }
 0x4b1   :  { %v3384_v15 = vpop.permute.xlu1 %3383  ;;  %2759 = vmatpush1.bf16.msra.mxu0 %v2758_v60 }
 0x4b2   :  { %v3386_v13 = vunpack.i.h.bf16 %v3384_v15  ;;  %v3385_v4 = vunpack.i.l.bf16 %v3384_v15  ;;  %2760 = vmatprep.subr.bf16.mxu0 %v3421_v22 }
 0x4b4   :  { %v2761_v53 = vpack.c.bf16 %v3386_v13, %v3385_v4 }
 0x4b6   :  { %v3389_v21 = vpop.permute.xlu1 %3388  ;;  %2762 = vmatpush1.bf16.msra.mxu0 %v2761_v53 }
 0x4b7   :  { %v3391_v5 = vunpack.i.h.bf16 %v3389_v21  ;;  %v3390_v3 = vunpack.i.l.bf16 %v3389_v21  ;;  %2763 = vmatprep.subr.bf16.mxu0 %v3421_v22 }
 0x4b9   :  { %v2764_v43 = vpack.c.bf16 %v3391_v5, %v3390_v3 }
 0x4ba   :  { %v3394_v16 = vpop.permute.xlu1 %3393 }
 0x4bb   :  { %v3396_v55 = vunpack.i.h.bf16 %v3394_v16  ;;  %v3395_v20 = vunpack.i.l.bf16 %v3394_v16  ;;  %2765 = vmatpush1.bf16.msra.mxu0 %v2764_v43 }
 0x4bc   :  { %2766 = vmatprep.subr.bf16.mxu0 %v3421_v22 }
 0x4bd   :  { %v2767_v19 = vpack.c.bf16 %v3396_v55, %v3395_v20 }
 0x4bf   :  { %2768 = vmatpush1.bf16.msra.mxu0 %v2767_v19 }
 0x4c0   :  { %2769 = vmatprep.subr.bf16.mxu0 %v3421_v22 }
 0x4c3   :  { %2771 = vmatpush1.bf16.msra.mxu0 %v2770_v6 }
 0x4c6   :  { %1806 = vmatmul.mubr.f32.vlgmr.msra.gmra.mrb[24].mxu0 %v1407_v50 }
 0x4c7   :  { %2273 = vmatprep.mubr.msk.f32.mxu0 %vm1555_vm6, %v1412_v29 }
 0x4ca   :  { %1811 = vmatmul.mubr.f32.gmra.mrb[26].mxu0 %v1411_v33 }
 0x4cb   :  { %2274 = vmatprep.mubr.msk.f32.mxu0 %vm1555_vm6, %v1416_v2 }
 0x4ce   :  { %1816 = vmatmul.mubr.f32.gmra.mrb[28].mxu0 %v1415_v34 }
 0x4cf   :  { %2275 = vmatprep.mubr.msk.f32.mxu0 %vm1555_vm6, %v1420_v35 }
 0x4d2   :  { %1821 = vmatmul.mubr.f32.gmra.mrb[30].mxu0 %v1419_v23 }
 0x4d3   :  { %2276 = vmatprep.mubr.msk.f32.mxu0 %vm1555_vm6, %v1424_v58 }
 0x4d6   :  { %1826 = vmatmul.mubr.f32.gmra.mrb[32].mxu0 %v1423_v47 }
 0x4d7   :  { %2277 = vmatprep.mubr.msk.f32.mxu0 %vm1555_vm6, %v1428_v40 }
 0x4da   :  { %1831 = vmatmul.mubr.f32.gmra.mrb[34].mxu0 %v1427_v0 }
 0x4db   :  { %2278 = vmatprep.mubr.msk.f32.mxu0 %vm1555_vm6, %v1432_v41 }
 0x4de   :  { %1836 = vmatmul.mubr.f32.gmra.mrb[36].mxu0 %v1431_v61  ;;  %v1483_v61 = vpop.permute.xlu1 %1482 }
 0x4df   :  { %2279 = vmatprep.mubr.msk.f32.mxu0 %vm1555_vm6, %v1436_v63 }
 0x4e2   :  { %1841 = vmatmul.mubr.f32.gmra.mrb[38].mxu0 %v1435_v31 }
 0x4e3   :  { %2280 = vmatprep.mubr.msk.f32.mxu0 %vm1555_vm6, %v1440_v59 }
 0x4e6   :  { %1846 = vmatmul.mubr.f32.gmra.mrb[40].mxu0 %v1439_v10 }
 0x4e7   :  { %2281 = vmatprep.mubr.msk.f32.mxu0 %vm1555_vm6, %v1444_v49  ;;  %v1488_v49 = vpop.permute.xlu0 %1487 }
 0x4ea   :  { %1851 = vmatmul.mubr.f32.gmra.mrb[42].mxu0 %v1443_v7 }
 0x4eb   :  { %2282 = vmatprep.mubr.msk.f32.mxu0 %vm1555_vm6, %v1448_v48 }
 0x4ee   :  { %1856 = vmatmul.mubr.f32.gmra.mrb[44].mxu0 %v1447_v12 }
 0x4ef   :  { %2283 = vmatprep.mubr.msk.f32.mxu0 %vm1555_vm6, %v1452_v17 }
 0x4f2   :  { %1861 = vmatmul.mubr.f32.gmra.mrb[46].mxu0 %v1451_v8  ;;  %v1493_v8 = vpop.permute.xlu1 %1492 }
 0x4f3   :  { %2284 = vmatprep.mubr.msk.f32.mxu0 %vm1555_vm6, %v1456_v38 }
 0x4f6   :  { %1866 = vmatmul.mubr.f32.gmra.mrb[48].mxu0 %v1455_v28 }
 0x4f7   :  { %2285 = vmatprep.mubr.msk.f32.mxu0 %vm1555_vm6, %v1460_v46 }
 0x4fa   :  { %1871 = vmatmul.mubr.f32.gmra.mrb[50].mxu0 %v1459_v54 }
 0x4fb   :  { %2286 = vmatprep.mubr.msk.f32.mxu0 %vm1555_vm6, %v1464_v27 }
 0x4fe   :  { %1876 = vmatmul.mubr.f32.gmra.mrb[52].mxu0 %v1463_v36  ;;  %v1498_v36 = vpop.permute.xlu0 %1497 }
 0x531   :  { %v2425_v26 = vpop.f32.mrb[16].mxu1 }
 0x532   :  { %v2426_v44 = vpop.f32.mrb[17].mxu1 }
 0x533   :  { %v2427_v9 = vadd.f32 %v2426_v44, %v2425_v26 }
 0x535   :  { %v2428_v14 = vpop.f32.mrb[18].mxu1  ;;  %v1668_v63 = vadd.f32 %v2427_v9, %v1483_v61 }
 0x536   :  { %v2429_v51 = vpop.f32.mrb[19].mxu1 }
 0x537   :  { %v2430_v32 = vadd.f32 %v2429_v51, %v2428_v14  ;;  %v1503_v51 = vpop.permute.xlu1 %1502 }
 0x539   :  { %v2431_v30 = vpop.f32.mrb[20].mxu1  ;;  %v1673_v7 = vadd.f32 %v2430_v32, %v1488_v49 }
 0x53a   :  { %v2432_v57 = vpop.f32.mrb[21].mxu1 }
 0x53b   :  { %v2433_v37 = vadd.f32 %v2432_v57, %v2431_v30 }
 0x53d   :  { %v2434_v24 = vpop.f32.mrb[22].mxu1  ;;  %v1678_v28 = vadd.f32 %v2433_v37, %v1493_v8 }
 0x53e   :  { %v2435_v25 = vpop.f32.mrb[23].mxu1 }
 0x53f   :  { %v2436_v56 = vadd.f32 %v2435_v25, %v2434_v24 }
 0x541   :  { %v2437_v42 = vpop.f32.mrb[24].mxu1  ;;  %v1683_v26 = vadd.f32 %v2436_v56, %v1498_v36 }
 0x542   :  { %v2438_v11 = vpop.f32.mrb[25].mxu1 }
 0x543   :  { %v2439_v18 = vadd.f32 %v2438_v11, %v2437_v42  ;;  %v1508_v42 = vpop.permute.xlu0 %1507 }
 0x545   :  { %v2440_v45 = vpop.f32.mrb[26].mxu1  ;;  %v1688_v32 = vadd.f32 %v2439_v18, %v1503_v51 }
 0x546   :  { %v2441_v1 = vpop.f32.mrb[27].mxu1 }
 0x547   :  { %v4707_v60 = vadd.f32 %v2441_v1, %v2440_v45  ;;  %v1518_v18 = vpop.permute.xlu0 %1517 }
 0x549   :  { %v2443_v15 = vpop.f32.mrb[28].mxu1  ;;  %v1693_v37 = vadd.f32 %v4707_v60, %v1508_v42  ;;  %v1889_v42 = vld [vmem:[%s4839_s7 + $0x40] sm:$0xff] }
 0x54a   :  { %v2444_v13 = vpop.f32.mrb[29].mxu1 }
 0x54b   :  { %v4709_v4 = vadd.f32 %v2444_v13, %v2443_v15  ;;  %v1513_v15 = vpop.permute.xlu1 %1512 }
 0x54d   :  { %v2446_v53 = vpop.f32.mrb[30].mxu1  ;;  %v1698_v13 = vadd.f32 %v4709_v4, %v1513_v15  ;;  %v1528_v4 = vpop.permute.xlu0 %1527 }
 0x54e   :  { %v2447_v21 = vpop.f32.mrb[31].mxu1 }
 0x54f   :  { %v4711_v5 = vadd.f32 %v2447_v21, %v2446_v53  ;;  %v1523_v60 = vpop.permute.xlu1 %1522 }
 0x551   :  { %v2449_v3 = vpop.f32.mrb[32].mxu1 }
 0x552   :  { %v2450_v43 = vpop.f32.mrb[33].mxu1 }
 0x553   :  { %v4713_v39 = vadd.f32 %v2450_v43, %v2449_v3  ;;  %v1703_v43 = vadd.f32 %v4711_v5, %v1518_v18  ;;  %v1533_v5 = vpop.permute.xlu1 %1532 }
 0x555   :  { %v2452_v16 = vpop.f32.mrb[34].mxu1 }
 0x556   :  { %v2453_v55 = vpop.f32.mrb[35].mxu1 }
 0x557   :  { %v4715_v20 = vadd.f32 %v2453_v55, %v2452_v16 }
 0x559   :  { %v2455_v62 = vpop.f32.mrb[36].mxu1 }
 0x55a   :  { %v2456_v19 = vpop.f32.mrb[37].mxu1 }
 0x55b   :  { %v4719_v6 = vadd.f32 %v2456_v19, %v2455_v62 }
 0x55d   :  { %v2458_v50 = vpop.f32.mrb[38].mxu1 }
 0x55e   :  { %v2459_v29 = vpop.f32.mrb[39].mxu1 }
 0x55f   :  { %v4721_v33 = vadd.f32 %v2459_v29, %v2458_v50  ;;  %v1708_v50 = vadd.f32 %v4713_v39, %v1523_v60  ;;  %v1538_v39 = vpop.permute.xlu0 %1537 }
 0x561   :  { %v2461_v2 = vpop.f32.mrb[40].mxu1  ;;  %v1723_v49 = vadd.f32 %v4721_v33, %v1538_v39 }
 0x562   :  { %v2462_v34 = vpop.f32.mrb[41].mxu1 }
 0x563   :  { %v4723_v35 = vadd.f32 %v2462_v34, %v2461_v2 }
 0x565   :  { %v2464_v23 = vpop.f32.mrb[42].mxu1 }
 0x566   :  { %v2465_v58 = vpop.f32.mrb[43].mxu1 }
 0x567   :  { %v4725_v47 = vadd.f32 %v2465_v58, %v2464_v23  ;;  %v1713_v23 = vadd.f32 %v4715_v20, %v1528_v4  ;;  %v1543_v20 = vpop.permute.xlu1 %1542 }
 0x568   :  { %v1728_v8 = vadd.f32 %v4723_v35, %v1543_v20 }
 0x569   :  { %v2467_v40 = vpop.f32.mrb[44].mxu1 }
 0x56a   :  { %v2468_v0 = vpop.f32.mrb[45].mxu1 }
 0x56b   :  { %v4727_v41 = vadd.f32 %v2468_v0, %v2467_v40  ;;  %v1553_v33 = vpop.permute.xlu1 %1552 }
 0x599   :  { %v1807_v31 = vpop.f32.mrb[24].mxu0 }
 0x59a   :  { %v1808_v59 = vadd.f32 %v1807_v31, %v1668_v63  ;;  %v1809_v10 = vpop.f32.mrb[25].mxu0  ;;  %v1718_v63 = vadd.f32 %v4719_v6, %v1533_v5  ;;  %v1548_v6 = vpop.permute.xlu0 %1547 }
 0x59d   :  { %v1812_v48 = vpop.f32.mrb[26].mxu0 }
 0x59e   :  { %v1813_v12 = vadd.f32 %v1812_v48, %v1673_v7  ;;  %v1814_v17 = vpop.f32.mrb[27].mxu0 }
 0x5a0   :  { %v2773_v38 = vpack.c.bf16 %v1813_v12, %v1808_v59 }
 0x5a1   :  { %v1817_v46 = vpop.f32.mrb[28].mxu0 }
 0x5a2   :  { %v1818_v54 = vadd.f32 %v1817_v46, %v1678_v28  ;;  %v1819_v27 = vpop.f32.mrb[29].mxu0  ;;  %2774 = vmatpush3.bf16.msra.mxu1 %v2773_v38 }
 0x5a3   :  { %2775 = vmatprep.subr.bf16.mxu1 %v3421_v22 }
 0x5a5   :  { %v1822_v44 = vpop.f32.mrb[30].mxu0 }
 0x5a6   :  { %v1823_v9 = vadd.f32 %v1822_v44, %v1683_v26  ;;  %v1824_v14 = vpop.f32.mrb[31].mxu0 }
 0x5a8   :  { %v2776_v30 = vpack.c.bf16 %v1823_v9, %v1818_v54  ;;  %v1733_v54 = vadd.f32 %v4725_v47, %v1548_v6  ;;  %v1738_v9 = vadd.f32 %v4727_v41, %v1553_v33  ;;  %v1883_v47 = vld [vmem:[%s4839_s7 + $0x10] sm:$0xff]  ;;  %v1884_v41 = vld [vmem:[%s4839_s7 + $0x18] sm:$0xff] }
 0x5a9   :  { %v1827_v57 = vpop.f32.mrb[32].mxu0 }
 0x5aa   :  { %v1828_v24 = vadd.f32 %v1827_v57, %v1688_v32  ;;  %v1829_v25 = vpop.f32.mrb[33].mxu0  ;;  %2777 = vmatpush3.bf16.msra.mxu1 %v2776_v30  ;;  %v1881_v30 = vld [vmem:[%s4839_s7] sm:$0xff]  ;;  %v1886_v57 = vld [vmem:[%s4839_s7 + $0x28] sm:$0xff] }
 0x5ab   :  { %2778 = vmatprep.subr.bf16.mxu1 %v3421_v22  ;;  %v1885_v32 = vld [vmem:[%s4839_s7 + $0x20] sm:$0xff]  ;;  %v1888_v25 = vld [vmem:[%s4839_s7 + $0x38] sm:$0xff] }
 0x5ad   :  { %v1832_v11 = vpop.f32.mrb[34].mxu0 }
 0x5ae   :  { %v1833_v45 = vadd.f32 %v1832_v11, %v1693_v37  ;;  %v1834_v1 = vpop.f32.mrb[35].mxu0  ;;  %v1890_v37 = vld [vmem:[%s4839_s7 + $0x48] sm:$0xff]  ;;  %v1891_v11 = vld [vmem:[%s4839_s7 + $0x50] sm:$0xf] }
 0x5b0   :  { %v2779_v56 = vpack.c.bf16 %v1833_v45, %v1828_v24  ;;  %v1887_v24 = vld [vmem:[%s4839_s7 + $0x30] sm:$0xff]  ;;  %v2112_v45 = vld [vmem:[%s4840_s9] sm:$0xff] }
 0x5b1   :  { %v1837_v53 = vpop.f32.mrb[36].mxu0  ;;  %2654 = vmatprep.mubr.msk.f32.mxu0 %vm2126_vm9, %v2112_v45 }
 0x5b2   :  { %v1838_v21 = vadd.f32 %v1837_v53, %v1698_v13  ;;  %v1839_v3 = vpop.f32.mrb[37].mxu0  ;;  %2780 = vmatpush3.bf16.msra.mxu1 %v2779_v56  ;;  %v1906_v56 = vpop.permute.xlu0 %1905 }
 0x5b3   :  { %2781 = vmatprep.subr.bf16.mxu1 %v3421_v22  ;;  %v1911_v13 = vpop.permute.xlu1 %1910 }
 0x5b5   :  { %v1842_v16 = vpop.f32.mrb[38].mxu0 }
 0x5b6   :  { %v1843_v55 = vadd.f32 %v1842_v16, %v1703_v43  ;;  %v1844_v62 = vpop.f32.mrb[39].mxu0 }
 0x5b7   :  { %v1921_v62 = vpop.permute.xlu1 %1920 }
 0x5b8   :  { %v2782_v19 = vpack.c.bf16 %v1843_v55, %v1838_v21  ;;  %v1916_v55 = vpop.permute.xlu0 %1915 }
 0x5b9   :  { %v1847_v29 = vpop.f32.mrb[40].mxu0 }
 0x5ba   :  { %v1848_v2 = vadd.f32 %v1847_v29, %v1708_v50  ;;  %v1849_v34 = vpop.f32.mrb[41].mxu0  ;;  %2783 = vmatpush3.bf16.msra.mxu1 %v2782_v19 }
 0x5bb   :  { %2784 = vmatprep.subr.bf16.mxu1 %v3421_v22 }
 0x5bd   :  { %v1852_v58 = vpop.f32.mrb[42].mxu0 }
 0x5be   :  { %v1853_v40 = vadd.f32 %v1852_v58, %v1713_v23  ;;  %v1854_v0 = vpop.f32.mrb[43].mxu0  ;;  %v1926_v23 = vpop.permute.xlu0 %1925 }
 0x5bf   :  { %v1931_v58 = vpop.permute.xlu1 %1930 }
 0x5c0   :  { %v2785_v61 = vpack.c.bf16 %v1853_v40, %v1848_v2 }
 0x5c1   :  { %v1857_v31 = vpop.f32.mrb[44].mxu0 }
 0x5c2   :  { %v1858_v59 = vadd.f32 %v1857_v31, %v1718_v63  ;;  %v1859_v10 = vpop.f32.mrb[45].mxu0  ;;  %2786 = vmatpush3.bf16.msra.mxu1 %v2785_v61 }
 0x5c3   :  { %2787 = vmatprep.subr.bf16.mxu1 %v3421_v22  ;;  %v1936_v10 = vpop.permute.xlu0 %1935  ;;  %v1941_v39 = vpop.permute.xlu1 %1940 }
 0x5c5   :  { %v1862_v7 = vpop.f32.mrb[46].mxu0 }
 0x5c6   :  { %v1863_v48 = vadd.f32 %v1862_v7, %v1723_v49  ;;  %v1864_v12 = vpop.f32.mrb[47].mxu0 }
 0x5c8   :  { %v2788_v17 = vpack.c.bf16 %v1863_v48, %v1858_v59 }
 0x5c9   :  { %v1867_v38 = vpop.f32.mrb[48].mxu0 }
 0x5ca   :  { %v1868_v28 = vadd.f32 %v1867_v38, %v1728_v8  ;;  %v1869_v46 = vpop.f32.mrb[49].mxu0  ;;  %2789 = vmatpush3.bf16.msra.mxu1 %v2788_v17  ;;  %v1946_v38 = vpop.permute.xlu0 %1945 }
 0x5cb   :  { %2790 = vmatprep.subr.bf16.mxu1 %v3421_v22  ;;  %v1882_v22 = vld [vmem:[%s4839_s7 + $0x8] sm:$0xff] }
 0x5cd   :  { %v1872_v27 = vpop.f32.mrb[50].mxu0 }
 0x5ce   :  { %v1873_v36 = vadd.f32 %v1872_v27, %v1733_v54  ;;  %v1874_v26 = vpop.f32.mrb[51].mxu0 }
 0x5cf   :  { %v1956_v26 = vpop.permute.xlu0 %1955 }
 0x5d0   :  { %v2791_v44 = vpack.c.bf16 %v1873_v36, %v1868_v28  ;;  %v1951_v28 = vpop.permute.xlu1 %1950 }
 0x5d1   :  { %v1877_v14 = vpop.f32.mrb[52].mxu0 }
 0x5d2   :  { %v1878_v51 = vadd.f32 %v1877_v14, %v1738_v9  ;;  %2792 = vmatpush3.bf16.msra.mxu1 %v2791_v44  ;;  %v1879_v35 = vpop.f32.mrb[53].mxu0  ;;  %v2113_v14 = vld [vmem:[%s4840_s9 + $0x8] sm:$0x3] }
 0x5d3   :  { %2597 = vmatprep.subr.mxu1 %v3429_v52 }
 0x5d6   :  { %2598 = vmatpush3.msra.mxu1 %v1878_v51  ;;  %v2124_v51 = vpop.permute.xlu0 %2123 }
 0x5d7   :  { %2600 = vmatmul.mubr.msk.f32.vlgmr.msra.gmra.mrb[46].mxu1 %vm1958_vm8, %v1881_v30  ;;  %v2119_v30 = vpop.permute.xlu1 %2118 }
 0x5d8   :  { %2602 = vmatprep.mubr.msk.f32.mxu1 %vm3428_vm7, %v3429_v52 }
 0x5db   :  { %2603 = vmatmul.mubr.msk.f32.gmra.mrb[48].mxu1 %vm1958_vm8, %v1882_v22 }
 0x5dc   :  { %2605 = vmatprep.mubr.msk.f32.mxu1 %vm3428_vm7, %v3429_v52 }
 0x5df   :  { %2606 = vmatmul.mubr.msk.f32.gmra.mrb[50].mxu1 %vm1958_vm8, %v1883_v47 }
 0x5e0   :  { %2608 = vmatprep.mubr.msk.f32.mxu1 %vm3428_vm7, %v3429_v52 }
 0x5e3   :  { %2609 = vmatmul.mubr.msk.f32.gmra.mrb[52].mxu1 %vm1958_vm8, %v1884_v41 }
 0x5e4   :  { %2611 = vmatprep.mubr.msk.f32.mxu1 %vm3428_vm7, %v3429_v52 }
 0x5e7   :  { %2612 = vmatmul.mubr.msk.f32.gmra.mrb[54].mxu1 %vm1958_vm8, %v1885_v32 }
 0x5e8   :  { %2614 = vmatprep.mubr.msk.f32.mxu1 %vm3428_vm7, %v3429_v52 }
 0x5eb   :  { %2615 = vmatmul.mubr.msk.f32.gmra.mrb[56].mxu1 %vm1958_vm8, %v1886_v57 }
 0x5ec   :  { %2617 = vmatprep.mubr.msk.f32.mxu1 %vm3428_vm7, %v3429_v52 }
 0x5ef   :  { %2618 = vmatmul.mubr.msk.f32.gmra.mrb[58].mxu1 %vm1958_vm8, %v1887_v24 }
 0x5f0   :  { %2620 = vmatprep.mubr.msk.f32.mxu1 %vm3428_vm7, %v3429_v52 }
 0x5f3   :  { %2621 = vmatmul.mubr.msk.f32.gmra.mrb[60].mxu1 %vm1958_vm8, %v1888_v25 }
 0x5f4   :  { %2623 = vmatprep.mubr.msk.f32.mxu1 %vm3428_vm7, %v3429_v52 }
 0x5f7   :  { %2624 = vmatmul.mubr.msk.f32.gmra.mrb[62].mxu1 %vm1958_vm8, %v1889_v42 }
 0x5f8   :  { %2626 = vmatprep.mubr.msk.f32.mxu1 %vm3428_vm7, %v3429_v52 }
 0x5fb   :  { %2627 = vmatmul.mubr.msk.f32.gmra.mrb[64].mxu1 %vm1958_vm8, %v1890_v37 }
 0x5fc   :  { %2629 = vmatprep.mubr.msk.f32.mxu1 %vm3428_vm7, %v3429_v52 }
 0x5ff   :  { %2630 = vmatmul.mubr.msk.f32.gmra.mrb[66].mxu1 %vm1958_vm8, %v1891_v11 }
 0x6aa   :  { %v2058_v1 = vpop.f32.mrb[46].mxu1 }
 0x6ab   :  { %v2601_v15 = vpop.f32.mrb[47].mxu1  ;;  %v2059_v21 = vadd.f32 %v2058_v1, %v1906_v56 }
 0x6ae   :  { %v2063_v53 = vpop.f32.mrb[48].mxu1 }
 0x6af   :  { %v2064_v52 = vadd.f32 %v2063_v53, %v1911_v13  ;;  %v2604_v3 = vpop.f32.mrb[49].mxu1 }
 0x6b1   :  { %v2793_v18 = vpack.c.bf16 %v2064_v52, %v2059_v21 }
 0x6b2   :  { %v2068_v43 = vpop.f32.mrb[50].mxu1 }
 0x6b3   :  { %2794 = vmatprep.subr.bf16.mxu0 %v2793_v18  ;;  %v2607_v16 = vpop.f32.mrb[51].mxu1  ;;  %v2069_v19 = vadd.f32 %v2068_v43, %v1916_v55 }
 0x6b4   :  { %2796 = vmatpush3.bf16.msra.mxu0 %v2793_v18 }
 0x6b6   :  { %v2073_v60 = vpop.f32.mrb[52].mxu1 }
 0x6b7   :  { %v2074_v50 = vadd.f32 %v2073_v60, %v1921_v62  ;;  %v2610_v29 = vpop.f32.mrb[53].mxu1 }
 0x6b9   :  { %v2797_v2 = vpack.c.bf16 %v2074_v50, %v2069_v19 }
 0x6ba   :  { %v2078_v34 = vpop.f32.mrb[54].mxu1 }
 0x6bb   :  { %2798 = vmatprep.subr.bf16.mxu0 %v2797_v2  ;;  %v2613_v4 = vpop.f32.mrb[55].mxu1  ;;  %v2079_v0 = vadd.f32 %v2078_v34, %v1926_v23 }
 0x6bc   :  { %2800 = vmatpush3.bf16.msra.mxu0 %v2797_v2 }
 0x6be   :  { %v2083_v40 = vpop.f32.mrb[56].mxu1 }
 0x6bf   :  { %v2084_v5 = vadd.f32 %v2083_v40, %v1931_v58  ;;  %v2616_v61 = vpop.f32.mrb[57].mxu1 }
 0x6c1   :  { %v2801_v63 = vpack.c.bf16 %v2084_v5, %v2079_v0 }
 0x6c2   :  { %v2088_v31 = vpop.f32.mrb[58].mxu1 }
 0x6c3   :  { %2802 = vmatprep.subr.bf16.mxu0 %v2801_v63  ;;  %v2619_v59 = vpop.f32.mrb[59].mxu1  ;;  %v2089_v7 = vadd.f32 %v2088_v31, %v1936_v10 }
 0x6c4   :  { %2804 = vmatpush3.bf16.msra.mxu0 %v2801_v63 }
 0x6c6   :  { %v2093_v49 = vpop.f32.mrb[60].mxu1 }
 0x6c7   :  { %v2094_v48 = vadd.f32 %v2093_v49, %v1941_v39  ;;  %v2622_v12 = vpop.f32.mrb[61].mxu1 }
 0x6c9   :  { %v2805_v20 = vpack.c.bf16 %v2094_v48, %v2089_v7 }
 0x6ca   :  { %v2098_v17 = vpop.f32.mrb[62].mxu1 }
 0x6cb   :  { %2806 = vmatprep.subr.bf16.mxu0 %v2805_v20  ;;  %v2625_v8 = vpop.f32.mrb[63].mxu1  ;;  %v2099_v6 = vadd.f32 %v2098_v17, %v1946_v38 }
 0x6cc   :  { %2808 = vmatpush3.bf16.msra.mxu0 %v2805_v20 }
 0x6ce   :  { %v2103_v46 = vpop.f32.mrb[64].mxu1 }
 0x6cf   :  { %v2104_v54 = vadd.f32 %v2103_v46, %v1951_v28  ;;  %v2628_v27 = vpop.f32.mrb[65].mxu1 }
 0x6d1   :  { %v2809_v36 = vpack.c.bf16 %v2104_v54, %v2099_v6 }
 0x6d2   :  { %v2108_v33 = vpop.f32.mrb[66].mxu1 }
 0x6d3   :  { %v2109_v44 = vadd.f32 %v2108_v33, %v1956_v26  ;;  %2810 = vmatprep.subr.bf16.mxu0 %v2809_v36  ;;  %v2631_v9 = vpop.f32.mrb[67].mxu1 }
 0x6d4   :  { %2812 = vmatpush3.bf16.msra.mxu0 %v2809_v36 }
 0x6d5   :  { %2652 = vmatprep.subr.msk.mxu0 %vm2133_vm10, %v2109_v44 }
 0x6d8   :  { %2653 = vmatpush3.msk.msra.mxu0 %vm2133_vm10, %v2109_v44 }
 0x6d9   :  { %2655 = vmatmul.mubr.msk.f32.vlgmr.msra.gmra.mrb[54].mxu0 %vm2126_vm9, %v2113_v14 }
 0x7ac   :  { %v2656_v35 = vpop.f32.mrb[54].mxu0 }
 0x7ad   :  { %v2209_v22 = vadd.f32 %v2656_v35, %v2124_v51  ;;  %v2203_v47 = vpop.f32.mrb[55].mxu0 }
 0x7ae   :  { %v2204_v41 = vadd.f32 %v2203_v47, %v2119_v30 }
 0x7af   :  { %v2215_v32 = vsel %vm2214_vm11, %v2209_v22, -inf }
 0x7b0   :  { %v2213_v57 = vsel %vm2212_vm12, %v2204_v41, -inf }
 0x7b1   :  { %v2216_v24 = vmax.f32 %v2213_v57, %v2215_v32 }
 0x7b3   :  { %v2217_v25 = vrot.slane %v2216_v24, 4 }
 0x7b5   :  { %v2218_v42 = vmax.f32 %v2216_v24, %v2217_v25 }
 0x7b7   :  { %v2219_v37 = vrot.slane %v2218_v42, 2 }
 0x7b9   :  { %v2220_v11 = vmax.f32 %v2218_v42, %v2219_v37 }
 0x7bb   :  { %v2221_v45 = vrot.slane %v2220_v11, 1 }
 0x7bd   :  { %v2222_v1 = vmax.f32 %v2220_v11, %v2221_v45 }
 0x7bf   :  { %v2223_v15 = vsub.f32 %v2204_v41, %v2222_v1  ;;  %v2224_v56 = vsub.f32 %v2209_v22, %v2222_v1 }
 0x7c1   :  { %v2225_v13 = vmul.f32 1.442695, %v2223_v15  ;;  %v2227_v53 = vmul.f32 1.442695, %v2224_v56 }
 0x7c3   :  { %3402 = vpow2.f32 %v2225_v13 }
 0x7c4   :  { %3404 = vpow2.f32 %v2227_v53 }
 0x7cd   :  { %v3403_v21 = vpop.eup %3402 }
 0x7ce   :  { %v3405_v52 = vpop.eup %3404  ;;  %v2229_v3 = vsel %vm2212_vm12, %v3403_v21, 0.0 }
 0x7cf   :  { %v2230_v18 = vsel %vm2214_vm11, %v3405_v52, 0.0 }
 0x7d0   :  { %v2231_v43 = vadd.f32 %v2230_v18, %v2229_v3 }
 0x7d2   :  { %v2232_v16 = vrot.slane %v2231_v43, 4 }
 0x7d4   :  { %v2233_v55 = vadd.f32 %v2232_v16, %v2231_v43 }
 0x7d6   :  { %v2234_v62 = vrot.slane %v2233_v55, 2 }
 0x7d8   :  { %v2235_v60 = vadd.f32 %v2234_v62, %v2233_v55 }
 0x7da   :  { %v2236_v19 = vrot.slane %v2235_v60, 1 }
 0x7dc   :  { %v2237_v50 = vadd.f32 %v2236_v19, %v2235_v60 }
 0x7de   :  { %3406 = vlog2.f32 %v2237_v50 }
 0x7e8   :  { %v3407_v29 = vpop.eup %3406 }
 0x7e9   :  { %v2239_v2 = vmul.f32 0.6931472, %v3407_v29 }
 0x7eb   :  { %v2240_v34 = vsub.f32 %v2223_v15, %v2239_v2  ;;  %v2241_v4 = vsub.f32 %v2224_v56, %v2239_v2 }
 0x7ed   :  { %2242 = vst.msk [vmem:[%s4841_s11] sm:$0xff] %vm2212_vm12, %v2240_v34 }
 0x7ee   :  { %2243 = vst.msk [vmem:[%s4841_s11 + $0x8] sm:$0x3] %vm2214_vm11, %v2241_v4 }

</bundles_post_ra>
